<compile_context>
chip_gen: v6e
topology: v6e:2x2x1
jax: 0.10.0
libtpu: 0.0.40
codegen_flags: <defaults>
</compile_context>

<pallas_src>
import functools

import jax
import jax.numpy as jnp
from jax.experimental import pallas as pl
from jax.experimental.pallas import tpu as pltpu


def _round_up(x, m):
    return (x + m - 1) // m * m


def _pick_row_tile(ho, wo, wp, cin_p, cout, cpad, kh, kw, budget_bytes=24 << 20):
    """Largest row tile TH (dividing Ho, lane-dense TH*Wo or TH == Ho) whose total resident
    pass-1 VMEM fits the budget.  Counts the haloed bf16 slab, bf16 weights, f32 y tile and
    f32 stats (each double-buffered) plus in-kernel acc / merged-LHS scratch.  The 24 MiB
    budget clears v7x's 32 MiB scoped default (64 MiB physical) with headroom."""
    def need(t):
        slab = 2 * (t + kh - 1) * wp * cin_p * 2            # bf16 haloed input slab x2
        wts = 2 * kh * (kw * cin_p) * cpad * 2              # bf16 weights x2
        ytile = 2 * cout * t * wo * 4                       # f32 conv-out tile x2
        stats = 2 * 8 * cpad * 4                            # f32 partial stats x2
        scratch = t * wo * cpad * 4 + t * wo * kw * cin_p * 2   # f32 acc + bf16 merged LHS
        return slab + wts + ytile + stats + scratch

    cands = [t for t in range(1, ho + 1)
             if ho % t == 0 and (t == ho or (t * wo) % 128 == 0)]
    fitting = [t for t in cands if need(t) <= budget_bytes]
    t = max(fitting) if fitting else min(cands)
    return t, need(t)


def _pick_row_group(r_tiles, tile_elems, cout, budget_bytes=8 << 20):
    """Merge row tiles for the HBM-bound pass 2 (bigger blocks -> closer to HBM roofline)."""
    best = 1
    for g in range(1, r_tiles + 1):
        if r_tiles % g == 0 and 4 * cout * g * tile_elems * 4 <= budget_bytes:
            best = g
    return best


# --------------------- Pass 1: fused conv (MXU) + BN partial statistics ---------------------

def _conv_stats_kernel(xs_ref, w_ref, y_ref, stats_ref, *, kh, kw, th, wo, cin_p, cout, cpad):
    # xs_ref:    (1, 1, th+kh-1, wp, cin_p) bf16  haloed row slab
    # w_ref:     (kh, kw*cin_p, cpad)       bf16  weights, kw taps merged into K
    # y_ref:     (1, cout, th*wo)           f32   conv output tile, NCHW-flat (lane-dense)
    # stats_ref: (1, 1, 8, cpad)            f32   row0 = per-channel sum, row1 = sum-of-squares
    slab = xs_ref[0, 0, :, :, :]                             # (th+kh-1, wp, cin_p) bf16
    acc = None
    for i in range(kh):
        rows = slab[i:i + th]                                # (th, wp, cin_p) static slice
        lhs = jnp.concatenate([rows[:, j:j + wo, :] for j in range(kw)],
                              axis=-1).reshape(th * wo, kw * cin_p)
        d = jnp.dot(lhs, w_ref[i], preferred_element_type=jnp.float32)
        acc = d if acc is None else acc + d                  # init from first dot (no zeros+add)
    s = jnp.sum(acc, axis=0, keepdims=True)                  # (1, cpad)
    ss = jnp.sum(acc * acc, axis=0, keepdims=True)           # (1, cpad)
    stats_ref[0, 0, :, :] = jnp.concatenate(
        [s, ss, jnp.zeros((6, cpad), jnp.float32)], axis=0)
    # Slice-before-transpose (16x less XLU / 16x less HBM writeback when cout << cpad).
    y_ref[0, :, :] = acc[:, :cout].T


# ------------------ Pass 2: tiled normalize (folded scale/shift) + LeakyReLU ------------------

def _bn_lrelu_kernel(y_ref, scale_ref, shift_ref, o_ref, *, neg_slope):
    # y_ref/o_ref: (1, cout, tile) f32 NCHW-flat; scale/shift: (cout, 1) folded BN constants.
    z = y_ref[0, :, :] * scale_ref[:, :] + shift_ref[:, :]
    o_ref[0, :, :] = jnp.where(z >= 0, z, neg_slope * z)


# ----------------------------------------- Wrapper -----------------------------------------

def conv2d_block(x, weight, gamma, beta, *, padding=1, eps=1e-5, neg_slope=0.1):
    """x: (N, Cin, H, W) NCHW; weight: (Cout, Cin, KH, KW); returns NCHW (N, Cout, Ho, Wo)."""
    n, cin, h, w = x.shape
    cout, cin_w, kh, kw = weight.shape
    assert cin_w == cin
    ho = h + 2 * padding - kh + 1
    wo = w + 2 * padding - kw + 1
    hp, wp = h + 2 * padding, w + 2 * padding

    cin_p = _round_up(cin, 8)       # sublane-aligned contraction sub-block
    cpad = _round_up(cout, 128)     # lane-dense MXU output channels

    th, p1_need = _pick_row_tile(ho, wo, wp, cin_p, cout, cpad, kh, kw)
    r_tiles = ho // th
    m = n * ho * wo

    # Layout glue (one-time XLA fusion): NCHW -> padded NHWC, channel-pad, cast to bf16,
    # and pre-slice into haloed row slabs (kh-1 rows duplicated per tile; negligible).
    xp = jnp.transpose(x.astype(jnp.float32), (0, 2, 3, 1))
    xp = jnp.pad(xp, ((0, 0), (padding, padding), (padding, padding), (0, cin_p - cin)))
    xp = xp.astype(jnp.bfloat16)
    slabs = jnp.stack([xp[:, r * th: r * th + th + kh - 1] for r in range(r_tiles)], axis=1)
    # slabs: (n, r_tiles, th+kh-1, wp, cin_p) bf16

    # Weights: (Cout, Cin, kh, kw) -> (kh, kw*cin_p, cpad) bf16 with kw folded into K.
    wt = jnp.transpose(weight.astype(jnp.float32), (2, 3, 1, 0))          # (kh, kw, cin, cout)
    wt = jnp.pad(wt, ((0, 0), (0, 0), (0, cin_p - cin), (0, cpad - cout)))
    wt = wt.reshape(kh, kw * cin_p, cpad).astype(jnp.bfloat16)

    # ---------------- pass 1: fused conv + per-tile BN partial sums ----------------
    conv_kernel = functools.partial(_conv_stats_kernel, kh=kh, kw=kw, th=th, wo=wo,
                                    cin_p=cin_p, cout=cout, cpad=cpad)
    p1_flops = 2 * m * kh * (kw * cin_p) * cpad + 3 * m * cpad
    p1_bytes = slabs.size * 2 + wt.size * 2 + (m * cout + n * r_tiles * 8 * cpad) * 4
    vmem1 = int(min(max(2 * p1_need, 32 << 20), 48 << 20))
    y, stats = pl.pallas_call(
        conv_kernel,
        out_shape=(jax.ShapeDtypeStruct((n, cout, ho * wo), jnp.float32),
                   jax.ShapeDtypeStruct((n, r_tiles, 8, cpad), jnp.float32)),
        grid_spec=pltpu.PrefetchScalarGridSpec(
            num_scalar_prefetch=0,
            grid=(n, r_tiles),
            in_specs=[
                pl.BlockSpec((1, 1, th + kh - 1, wp, cin_p), lambda b, r: (b, r, 0, 0, 0)),
                pl.BlockSpec((kh, kw * cin_p, cpad), lambda b, r: (0, 0, 0)),
            ],
            out_specs=[
                pl.BlockSpec((1, cout, th * wo), lambda b, r: (b, 0, r)),
                pl.BlockSpec((1, 1, 8, cpad), lambda b, r: (b, r, 0, 0)),
            ],
        ),
        compiler_params=pltpu.CompilerParams(
            dimension_semantics=("parallel", "parallel"),
            vmem_limit_bytes=vmem1),
        cost_estimate=pl.CostEstimate(flops=int(p1_flops), transcendentals=0,
                                      bytes_accessed=int(p1_bytes)),
    )(slabs, wt)

    # ---- tiny finalize in plain JAX: fold BN stats + affine into per-channel scale/shift ----
    total = float(m)
    csum = jnp.sum(stats[:, :, 0, :cout], axis=(0, 1))                  # (cout,)
    cssq = jnp.sum(stats[:, :, 1, :cout], axis=(0, 1))                  # (cout,)
    mean = csum / total
    var = jnp.maximum(cssq / total - mean * mean, 0.0)                  # biased variance (train BN)
    scale = gamma.astype(jnp.float32) * jax.lax.rsqrt(var + eps)
    shift = beta.astype(jnp.float32) - mean * scale
    scale = scale.reshape(cout, 1)
    shift = shift.reshape(cout, 1)

    # ------------- pass 2: tiled normalize + LeakyReLU on the NCHW-flat layout -------------
    g = _pick_row_group(r_tiles, th * wo, cout)
    tile2 = g * th * wo
    r2_tiles = r_tiles // g
    bn_kernel = functools.partial(_bn_lrelu_kernel, neg_slope=neg_slope)
    mo = n * cout * ho * wo
    p2_bytes = (2 * mo + 2 * cout) * 4
    vmem2 = int(min(max(4 * (4 * cout * tile2 * 4), 16 << 20), 48 << 20))
    out_flat = pl.pallas_call(
        bn_kernel,
        out_shape=jax.ShapeDtypeStruct((n, cout, ho * wo), jnp.float32),
        grid_spec=pltpu.PrefetchScalarGridSpec(
            num_scalar_prefetch=0,
            grid=(n, r2_tiles),
            in_specs=[
                pl.BlockSpec((1, cout, tile2), lambda b, r: (b, 0, r)),
                pl.BlockSpec((cout, 1), lambda b, r: (0, 0)),
                pl.BlockSpec((cout, 1), lambda b, r: (0, 0)),
            ],
            out_specs=pl.BlockSpec((1, cout, tile2), lambda b, r: (b, 0, r)),
        ),
        compiler_params=pltpu.CompilerParams(
            dimension_semantics=("parallel", "parallel"),
            vmem_limit_bytes=vmem2),
        cost_estimate=pl.CostEstimate(flops=int(3 * mo), transcendentals=0,
                                      bytes_accessed=int(p2_bytes)),
    )(y, scale, shift)

    return out_flat.reshape(n, cout, ho, wo)


# ------------------------------------------- Main -------------------------------------------

if __name__ == "__main__":
    key = jax.random.PRNGKey(0)
    kx, kw_ = jax.random.split(key)

    N, Cin, H, W = 2, 4, 16, 16
    Cout, KH, KW = 8, 3, 3

    x = jax.random.normal(kx, (N, Cin, H, W), dtype=jnp.float32)
    weight = jax.random.normal(kw_, (Cout, Cin, KH, KW), dtype=jnp.float32) * 0.1
    gamma = jnp.ones((Cout,), dtype=jnp.float32)   # nn.BatchNorm2d default weight init
    beta = jnp.zeros((Cout,), dtype=jnp.float32)   # nn.BatchNorm2d default bias init

    out = jax.jit(conv2d_block)(x, weight, gamma, beta)
    out = jax.block_until_ready(out)

    # Reference: bf16 conv products with f32 accumulation (mirrors the MXU path), then
    # training-mode BatchNorm2d (biased var, eps=1e-5) + LeakyReLU(0.1) in f32.
    ref_conv = jax.lax.conv_general_dilated(
        x.astype(jnp.bfloat16), weight.astype(jnp.bfloat16),
        window_strides=(1, 1), padding=((1, 1), (1, 1)),
        dimension_numbers=("NCHW", "OIHW", "NCHW"),
        preferred_element_type=jnp.float32)
    mu = jnp.mean(ref_conv, axis=(0, 2, 3), keepdims=True)
    var = jnp.mean((ref_conv - mu) ** 2, axis=(0, 2, 3), keepdims=True)
    ref_bn = (ref_conv - mu) * jax.lax.rsqrt(var + 1e-5) \
        * gamma.reshape(1, Cout, 1, 1) + beta.reshape(1, Cout, 1, 1)
    ref = jnp.where(ref_bn >= 0, ref_bn, 0.1 * ref_bn)

    assert out.shape == (N, Cout, H, W)
    err = float(jnp.max(jnp.abs(out - ref)))
    assert jnp.allclose(out, ref, atol=2e-3, rtol=2e-3), err
    print("KERNEL_OK")
</pallas_src>

<mosaic_0001>
module attributes {stable_mosaic.version = 11 : i64} {
  func.func @_conv_stats_kernel(%arg0: i32, %arg1: i32, %arg2: memref<1x1x18x18x8xbf16, #tpu.memory_space<vmem>>, %arg3: memref<3x24x128xbf16, #tpu.memory_space<vmem>>, %arg4: memref<1x8x256xf32, #tpu.memory_space<vmem>>, %arg5: memref<1x1x8x128xf32, #tpu.memory_space<vmem>>) attributes {dimension_semantics = [#tpu.dimension_semantics<parallel>, #tpu.dimension_semantics<parallel>], iteration_bounds = array<i64: 2, 1>, scalar_prefetch = 0 : i64, scratch_operands = 0 : i64, tpu.core_type = #tpu.core_type<tc>, window_params = [{transform_indices = @transform_0, window_bounds = array<i64: 1, 1, 18, 18, 8>}, {pipeline_mode = #tpu.pipeline_mode<synchronous>, transform_indices = @transform_1, window_bounds = array<i64: 3, 24, 128>}, {transform_indices = @transform_2, window_bounds = array<i64: 1, 8, 256>}, {transform_indices = @transform_3, window_bounds = array<i64: 1, 1, 8, 128>}]} {
    %c0 = arith.constant 0 : index
    %c0_0 = arith.constant 0 : index
    %c0_1 = arith.constant 0 : index
    %c0_2 = arith.constant 0 : index
    %c0_3 = arith.constant 0 : index
    %0 = vector.load %arg2[%c0, %c0_0, %c0_1, %c0_2, %c0_3] : memref<1x1x18x18x8xbf16, #tpu.memory_space<vmem>>, vector<1x1x18x18x8xbf16>
    %1 = vector.shape_cast %0 : vector<1x1x18x18x8xbf16> to vector<18x18x8xbf16>
    %2 = vector.extract_strided_slice %1 {offsets = [0, 0, 0], sizes = [16, 18, 8], strides = [1, 1, 1]} : vector<18x18x8xbf16> to vector<16x18x8xbf16>
    %3 = vector.extract_strided_slice %2 {offsets = [0, 0, 0], sizes = [16, 16, 8], strides = [1, 1, 1]} : vector<16x18x8xbf16> to vector<16x16x8xbf16>
    %4 = vector.extract_strided_slice %2 {offsets = [0, 1, 0], sizes = [16, 16, 8], strides = [1, 1, 1]} : vector<16x18x8xbf16> to vector<16x16x8xbf16>
    %5 = vector.extract_strided_slice %2 {offsets = [0, 2, 0], sizes = [16, 16, 8], strides = [1, 1, 1]} : vector<16x18x8xbf16> to vector<16x16x8xbf16>
    %6 = tpu.concatenate %3, %4, %5 in 2 : vector<16x16x8xbf16>, vector<16x16x8xbf16>, vector<16x16x8xbf16> -> vector<16x16x24xbf16>
    %7 = vector.shape_cast %6 : vector<16x16x24xbf16> to vector<256x24xbf16>
    %c0_4 = arith.constant 0 : index
    %c0_5 = arith.constant 0 : index
    %c0_6 = arith.constant 0 : index
    %8 = vector.load %arg3[%c0_4, %c0_5, %c0_6] : memref<3x24x128xbf16, #tpu.memory_space<vmem>>, vector<1x24x128xbf16>
    %9 = vector.shape_cast %8 : vector<1x24x128xbf16> to vector<24x128xbf16>
    %cst = arith.constant dense<0.000000e+00> : vector<256x128xf32>
    %10 = tpu.matmul %7, %9, %cst {dimension_numbers = #tpu.dot_dimension_numbers<[1], [0], [0], [1], [0, 0, 1, 1], [], []>} : vector<256x24xbf16>, vector<24x128xbf16>, vector<256x128xf32> -> vector<256x128xf32>
    %11 = vector.extract_strided_slice %1 {offsets = [1, 0, 0], sizes = [16, 18, 8], strides = [1, 1, 1]} : vector<18x18x8xbf16> to vector<16x18x8xbf16>
    %12 = vector.extract_strided_slice %11 {offsets = [0, 0, 0], sizes = [16, 16, 8], strides = [1, 1, 1]} : vector<16x18x8xbf16> to vector<16x16x8xbf16>
    %13 = vector.extract_strided_slice %11 {offsets = [0, 1, 0], sizes = [16, 16, 8], strides = [1, 1, 1]} : vector<16x18x8xbf16> to vector<16x16x8xbf16>
    %14 = vector.extract_strided_slice %11 {offsets = [0, 2, 0], sizes = [16, 16, 8], strides = [1, 1, 1]} : vector<16x18x8xbf16> to vector<16x16x8xbf16>
    %15 = tpu.concatenate %12, %13, %14 in 2 : vector<16x16x8xbf16>, vector<16x16x8xbf16>, vector<16x16x8xbf16> -> vector<16x16x24xbf16>
    %16 = vector.shape_cast %15 : vector<16x16x24xbf16> to vector<256x24xbf16>
    %c1 = arith.constant 1 : index
    %c0_7 = arith.constant 0 : index
    %c0_8 = arith.constant 0 : index
    %17 = vector.load %arg3[%c1, %c0_7, %c0_8] : memref<3x24x128xbf16, #tpu.memory_space<vmem>>, vector<1x24x128xbf16>
    %18 = vector.shape_cast %17 : vector<1x24x128xbf16> to vector<24x128xbf16>
    %cst_9 = arith.constant dense<0.000000e+00> : vector<256x128xf32>
    %19 = tpu.matmul %16, %18, %cst_9 {dimension_numbers = #tpu.dot_dimension_numbers<[1], [0], [0], [1], [0, 0, 1, 1], [], []>} : vector<256x24xbf16>, vector<24x128xbf16>, vector<256x128xf32> -> vector<256x128xf32>
    %20 = arith.addf %10, %19 : vector<256x128xf32>
    %21 = vector.extract_strided_slice %1 {offsets = [2, 0, 0], sizes = [16, 18, 8], strides = [1, 1, 1]} : vector<18x18x8xbf16> to vector<16x18x8xbf16>
    %22 = vector.extract_strided_slice %21 {offsets = [0, 0, 0], sizes = [16, 16, 8], strides = [1, 1, 1]} : vector<16x18x8xbf16> to vector<16x16x8xbf16>
    %23 = vector.extract_strided_slice %21 {offsets = [0, 1, 0], sizes = [16, 16, 8], strides = [1, 1, 1]} : vector<16x18x8xbf16> to vector<16x16x8xbf16>
    %24 = vector.extract_strided_slice %21 {offsets = [0, 2, 0], sizes = [16, 16, 8], strides = [1, 1, 1]} : vector<16x18x8xbf16> to vector<16x16x8xbf16>
    %25 = tpu.concatenate %22, %23, %24 in 2 : vector<16x16x8xbf16>, vector<16x16x8xbf16>, vector<16x16x8xbf16> -> vector<16x16x24xbf16>
    %26 = vector.shape_cast %25 : vector<16x16x24xbf16> to vector<256x24xbf16>
    %c2 = arith.constant 2 : index
    %c0_10 = arith.constant 0 : index
    %c0_11 = arith.constant 0 : index
    %27 = vector.load %arg3[%c2, %c0_10, %c0_11] : memref<3x24x128xbf16, #tpu.memory_space<vmem>>, vector<1x24x128xbf16>
    %28 = vector.shape_cast %27 : vector<1x24x128xbf16> to vector<24x128xbf16>
    %cst_12 = arith.constant dense<0.000000e+00> : vector<256x128xf32>
    %29 = tpu.matmul %26, %28, %cst_12 {dimension_numbers = #tpu.dot_dimension_numbers<[1], [0], [0], [1], [0, 0, 1, 1], [], []>} : vector<256x24xbf16>, vector<24x128xbf16>, vector<256x128xf32> -> vector<256x128xf32>
    %30 = arith.addf %20, %29 : vector<256x128xf32>
    %cst_13 = arith.constant dense<0.000000e+00> : vector<128xf32>
    %31 = vector.multi_reduction <add>, %30, %cst_13 [0] : vector<256x128xf32> to vector<128xf32>
    %32 = vector.shape_cast %31 : vector<128xf32> to vector<1x128xf32>
    %33 = arith.mulf %30, %30 : vector<256x128xf32>
    %cst_14 = arith.constant dense<0.000000e+00> : vector<128xf32>
    %34 = vector.multi_reduction <add>, %33, %cst_14 [0] : vector<256x128xf32> to vector<128xf32>
    %35 = vector.shape_cast %34 : vector<128xf32> to vector<1x128xf32>
    %cst_15 = arith.constant 0.000000e+00 : f32
    %36 = vector.broadcast %cst_15 : f32 to vector<6x128xf32>
    %37 = tpu.concatenate %32, %35, %36 in 0 : vector<1x128xf32>, vector<1x128xf32>, vector<6x128xf32> -> vector<8x128xf32>
    %c0_16 = arith.constant 0 : index
    %c0_17 = arith.constant 0 : index
    %c0_18 = arith.constant 0 : index
    %c0_19 = arith.constant 0 : index
    %38 = vector.load %arg5[%c0_16, %c0_17, %c0_18, %c0_19] : memref<1x1x8x128xf32, #tpu.memory_space<vmem>>, vector<1x1x8x128xf32>
    %39 = vector.shape_cast %38 : vector<1x1x8x128xf32> to vector<8x128xf32>
    %40 = vector.shape_cast %37 : vector<8x128xf32> to vector<1x1x8x128xf32>
    tpu.vector_store %arg5[%c0_16, %c0_17, %c0_18, %c0_19], %40 {strides = array<i32>} : memref<1x1x8x128xf32, #tpu.memory_space<vmem>>, vector<1x1x8x128xf32>,
    %41 = vector.extract_strided_slice %30 {offsets = [0, 0], sizes = [256, 8], strides = [1, 1]} : vector<256x128xf32> to vector<256x8xf32>
    %42 = tpu.transpose %41, [1, 0] : vector<256x8xf32> -> vector<8x256xf32>
    %c0_20 = arith.constant 0 : index
    %c0_21 = arith.constant 0 : index
    %c0_22 = arith.constant 0 : index
    %43 = vector.load %arg4[%c0_20, %c0_21, %c0_22] : memref<1x8x256xf32, #tpu.memory_space<vmem>>, vector<1x8x256xf32>
    %44 = vector.shape_cast %43 : vector<1x8x256xf32> to vector<8x256xf32>
    %45 = vector.shape_cast %42 : vector<8x256xf32> to vector<1x8x256xf32>
    tpu.vector_store %arg4[%c0_20, %c0_21, %c0_22], %45 {strides = array<i32>} : memref<1x8x256xf32, #tpu.memory_space<vmem>>, vector<1x8x256xf32>,
    return
  }
  func.func @transform_0(%arg0: i32, %arg1: i32) -> (i32, i32, i32, i32, i32) {
    %c0_i32 = arith.constant 0 : i32
    %c0_i32_0 = arith.constant 0 : i32
    %c0_i32_1 = arith.constant 0 : i32
    %c0_i32_2 = arith.constant 0 : i32
    return %arg0, %arg1, %c0_i32, %c0_i32_0, %c0_i32_1 : i32, i32, i32, i32, i32
  }
  func.func @transform_1(%arg0: i32, %arg1: i32) -> (i32, i32, i32) {
    %c0_i32 = arith.constant 0 : i32
    %c0_i32_0 = arith.constant 0 : i32
    %c0_i32_1 = arith.constant 0 : i32
    %c0_i32_2 = arith.constant 0 : i32
    return %c0_i32, %c0_i32_0, %c0_i32_1 : i32, i32, i32
  }
  func.func @transform_2(%arg0: i32, %arg1: i32) -> (i32, i32, i32) {
    %c0_i32 = arith.constant 0 : i32
    %c0_i32_0 = arith.constant 0 : i32
    return %arg0, %c0_i32, %arg1 : i32, i32, i32
  }
  func.func @transform_3(%arg0: i32, %arg1: i32) -> (i32, i32, i32, i32) {
    %c0_i32 = arith.constant 0 : i32
    %c0_i32_0 = arith.constant 0 : i32
    %c0_i32_1 = arith.constant 0 : i32
    return %arg0, %arg1, %c0_i32, %c0_i32_0 : i32, i32, i32, i32
  }
}

module attributes {stable_mosaic.version = 11 : i64} {
  func.func @_bn_lrelu_kernel(%arg0: i32, %arg1: i32, %arg2: memref<1x8x256xf32, #tpu.memory_space<vmem>>, %arg3: memref<8x1xf32, #tpu.memory_space<vmem>>, %arg4: memref<8x1xf32, #tpu.memory_space<vmem>>, %arg5: memref<1x8x256xf32, #tpu.memory_space<vmem>>) attributes {dimension_semantics = [#tpu.dimension_semantics<parallel>, #tpu.dimension_semantics<parallel>], iteration_bounds = array<i64: 2, 1>, scalar_prefetch = 0 : i64, scratch_operands = 0 : i64, tpu.core_type = #tpu.core_type<tc>, window_params = [{transform_indices = @transform_0, window_bounds = array<i64: 1, 8, 256>}, {pipeline_mode = #tpu.pipeline_mode<synchronous>, transform_indices = @transform_1, window_bounds = array<i64: 8, 1>}, {pipeline_mode = #tpu.pipeline_mode<synchronous>, transform_indices = @transform_2, window_bounds = array<i64: 8, 1>}, {transform_indices = @transform_3, window_bounds = array<i64: 1, 8, 256>}]} {
    %c0 = arith.constant 0 : index
    %c0_0 = arith.constant 0 : index
    %c0_1 = arith.constant 0 : index
    %0 = vector.load %arg2[%c0, %c0_0, %c0_1] : memref<1x8x256xf32, #tpu.memory_space<vmem>>, vector<1x8x256xf32>
    %1 = vector.shape_cast %0 : vector<1x8x256xf32> to vector<8x256xf32>
    %c0_2 = arith.constant 0 : index
    %c0_3 = arith.constant 0 : index
    %2 = vector.load %arg3[%c0_2, %c0_3] : memref<8x1xf32, #tpu.memory_space<vmem>>, vector<8x1xf32>
    %3 = vector.broadcast %2 : vector<8x1xf32> to vector<8x256xf32>
    %4 = arith.mulf %1, %3 : vector<8x256xf32>
    %c0_4 = arith.constant 0 : index
    %c0_5 = arith.constant 0 : index
    %5 = vector.load %arg4[%c0_4, %c0_5] : memref<8x1xf32, #tpu.memory_space<vmem>>, vector<8x1xf32>
    %6 = vector.broadcast %5 : vector<8x1xf32> to vector<8x256xf32>
    %7 = arith.addf %4, %6 : vector<8x256xf32>
    %cst = arith.constant 0.000000e+00 : f32
    %8 = vector.broadcast %cst : f32 to vector<8x256xf32>
    %9 = arith.cmpf oge, %7, %8 : vector<8x256xf32>
    %cst_6 = arith.constant 1.000000e-01 : f32
    %10 = vector.broadcast %cst_6 : f32 to vector<8x256xf32>
    %11 = arith.mulf %10, %7 : vector<8x256xf32>
    %12 = arith.select %9, %7, %11 : vector<8x256xi1>, vector<8x256xf32>
    %c0_7 = arith.constant 0 : index
    %c0_8 = arith.constant 0 : index
    %c0_9 = arith.constant 0 : index
    %13 = vector.load %arg5[%c0_7, %c0_8, %c0_9] : memref<1x8x256xf32, #tpu.memory_space<vmem>>, vector<1x8x256xf32>
    %14 = vector.shape_cast %13 : vector<1x8x256xf32> to vector<8x256xf32>
    %15 = vector.shape_cast %12 : vector<8x256xf32> to vector<1x8x256xf32>
    tpu.vector_store %arg5[%c0_7, %c0_8, %c0_9], %15 {strides = array<i32>} : memref<1x8x256xf32, #tpu.memory_space<vmem>>, vector<1x8x256xf32>,
    return
  }
  func.func @transform_0(%arg0: i32, %arg1: i32) -> (i32, i32, i32) {
    %c0_i32 = arith.constant 0 : i32
    %c0_i32_0 = arith.constant 0 : i32
    return %arg0, %c0_i32, %arg1 : i32, i32, i32
  }
  func.func @transform_1(%arg0: i32, %arg1: i32) -> (i32, i32) {
    %c0_i32 = arith.constant 0 : i32
    %c0_i32_0 = arith.constant 0 : i32
    %c0_i32_1 = arith.constant 0 : i32
    return %c0_i32, %c0_i32_0 : i32, i32
  }
  func.func @transform_2(%arg0: i32, %arg1: i32) -> (i32, i32) {
    %c0_i32 = arith.constant 0 : i32
    %c0_i32_0 = arith.constant 0 : i32
    %c0_i32_1 = arith.constant 0 : i32
    return %c0_i32, %c0_i32_0 : i32, i32
  }
  func.func @transform_3(%arg0: i32, %arg1: i32) -> (i32, i32, i32) {
    %c0_i32 = arith.constant 0 : i32
    %c0_i32_0 = arith.constant 0 : i32
    return %arg0, %c0_i32, %arg1 : i32, i32, i32
  }
}

</mosaic_0001>

<bundles_post_ra>
// kernel: conv2d_block.3
= control target key start
LH: loop header
LB: loop body
LE: loop exit
PB: predicated region body
PF: predicated region fallthrough
CT: control target
= control target key end

     0   :  { %s407_s12 = smov 0   ;;  %s409_s13 = smov 0   ;;  %s446_s0 = inlined_call_operand.vmem [shape: f32[2,8,256], index: 0, kind: input, shape index: {}]   ;;  %s447_s1 = inlined_call_operand.vmem [shape: f32[8,1], index: 1, kind: input, shape index: {}]   ;;  %s448_s2 = inlined_call_operand.vmem [shape: f32[8,1], index: 2, kind: input, shape index: {}]   ;;  %s449_s3 = inlined_call_operand.vmem [shape: f32[2,8,256], index: 3, kind: output, shape index: {}]  }
   0x1   :  { %s411_s14 = smov 0  }
   0x2 LB: > { %s25_s15 = sadd.s32 1, %s380_s13  ;;  %p327_p0 = scmp.ge.s32.totalorder %s384_s14, 1  ;;  %s384_s14 = sphi %s411_s14, %s13_s14   ;;  %s380_s13 = sphi %s409_s13, %s451_s13   ;;  %s376_s12 = sphi %s407_s12, %s450_s12  }
   0x3   : > { %p27_p1 = scmp.ge.s32.totalorder %s25_s15, 2  ;;  %p158_p2 = scmp.lt.s32.totalorder %s384_s14, 3 }
   0x5   : > { %s453_s15 = smov (%p27_p1, %s25_s15), 0  ;;  %p159_p3 = pnand %p327_p0, %p158_p2 }
   0x6   : > { %p191_p4 = scmp.lt.s32.totalorder (!%p159_p3), %s376_s12, 1 }
   0x7   : > { %162 = sbr.rel (%p159_p3) target bundleno = 148 (0x94), region = 32 }
   0xc   : > { %v212_v0 = vld [vmem:[%s447_s1] sm:$0xff]  ;;  %v386_v1 = vmov 0   ;;  %s455_s12 = smov (!%p191_p4, %s376_s12), 1 }
   0xd   : > { %361 = vset.pattern.permute.xlu0 %v386_v1  ;;  %v220_v2 = vld [vmem:[%s448_s2] sm:$0xff]  ;;  %s334_s20 = sshll.u32 %s455_s12, 4 }
   0xe   : > { %215 = vperm.xlu0 %361, %v212_v0   ;;  %s198_s23 = scalar_lea.vmem %s446_s0, %s334_s20  ;;  %s208_s26 = scalar_lea.vmem %s449_s3, %s334_s20 }
   0xf   : > { %v210_v4 = vld [vmem:[%s198_s23] sm:$0xff]  ;;  %v211_v5 = vld [vmem:[%s198_s23 + $0x8] sm:$0xff] }
  0x12   : > { %223 = vperm.xlu0 %361, %v220_v2  }
  0x89   : > { %v216_v3 = vpop.permute.xlu0 %215 }
  0x8a   : > { %v218_v6 = vmul.f32 %v216_v3, %v210_v4  ;;  %v219_v7 = vmul.f32 %v216_v3, %v211_v5 }
  0x8d   : > { %v224_v8 = vpop.permute.xlu0 %223 }
  0x8e   : > { %v226_v9 = vadd.f32 %v224_v8, %v218_v6  ;;  %v227_v10 = vadd.f32 %v224_v8, %v219_v7 }
  0x90   : > { %vm228_vm0 = vcmp.ge.f32.partialorder %v226_v9, 0.0  ;;  %vm229_vm1 = vcmp.ge.f32.partialorder %v227_v10, 0.0  ;;  %v230_v11 = vmul.f32 0.1, %v226_v9  ;;  %v231_v12 = vmul.f32 0.1, %v227_v10 }
  0x92   : > { %v232_v13 = vsel %vm228_vm0, %v226_v9, %v230_v11  ;;  %v233_v14 = vsel %vm229_vm1, %v227_v10, %v231_v12 }
  0x93   : > { %234 = vst [vmem:[%s208_s26] sm:$0xff] %v232_v13  ;;  %235 = vst [vmem:[%s208_s26 + $0x8] sm:$0xff] %v233_v14 }
  0x94 PF: > { %s13_s14 = sadd.s32 1, %s384_s14   ;;  %s450_s12 = smov %s380_s13 }
  0x95   : > { %p10_p5 = scmp.ge.s32.totalorder %s13_s14, 4   ;;  %s451_s13 = smov %s453_s15 }
  0x97   :  { %12 = sbr.rel (!%p10_p5) target bundleno = 2 (0x2), region = 62 }

// kernel: conv2d_block.2
= control target key start
LH: loop header
LB: loop body
LE: loop exit
PB: predicated region body
PF: predicated region fallthrough
CT: control target
= control target key end

     0   :  { %s2145_s12 = smov 0   ;;  %s2147_s13 = smov 0   ;;  %s2723_s0 = inlined_call_operand.vmem [shape: bf16[2,1,18,18,8], index: 0, kind: input, shape index: {}]   ;;  %s2724_s1 = inlined_call_operand.vmem [shape: bf16[3,24,128], index: 1, kind: input, shape index: {}]   ;;  %s2725_s2 = inlined_call_operand.vmem [shape: f32[2,8,256], index: 2, kind: output, shape index: {0}]   ;;  %s2726_s3 = inlined_call_operand.vmem [shape: f32[2,1,8,128], index: 3, kind: output, shape index: {1}]  }
   0x1   :  { %s2149_s14 = smov 0  }
   0x2 LB: > { %s26_s15 = sadd.s32 1, %s2117_s13  ;;  %p1756_p0 = scmp.ge.s32.totalorder %s2121_s14, 1  ;;  %s2121_s14 = sphi %s2149_s14, %s14_s14   ;;  %s2117_s13 = sphi %s2147_s13, %s2728_s13   ;;  %s2113_s12 = sphi %s2145_s12, %s2727_s12  }
   0x3   : > { %p28_p1 = scmp.ge.s32.totalorder %s26_s15, 2  ;;  %p162_p2 = scmp.lt.s32.totalorder %s2121_s14, 3 }
   0x5   : > { %s2730_s15 = smov (%p28_p1, %s26_s15), 0  ;;  %p163_p3 = pnand %p1756_p0, %p162_p2 }
   0x6   : > { %p201_p4 = scmp.lt.s32.totalorder (!%p163_p3), %s2113_s12, 1  ;;  %s2123_s22 = smov (!%p163_p3), 16  }
   0x7   : > { %166 = sbr.rel (%p163_p3) target bundleno = 560 (0x230), region = 28  ;;  %s2124_s23 = smov (!%p163_p3), 8  }
   0xc   : > { %s2732_s12 = smov (!%p201_p4, %s2113_s12), 1  ;;  %v2091_v0 = vld [vmem:[%s2724_s1 + $0x14] ss:$0 sps:$4 sm:$0xff]   ;;  %vm862_vm0 = vcmask 1043456   ;;  %vm635_vm1 = vcmask 1046528   ;;  %vm716_vm3 = vcmask 64512  }
   0xd   : > { %s2030_s16 = smul.u32 216, %s2732_s12  ;;  %2026 = vmatprep.subr.msk.bf16.mxu0 %vm862_vm0, %v2091_v0  ;;  %2027 = vmatprep.subr.msk.bf16.mxu1 %vm862_vm0, %v2091_v0  ;;  %v864_v4 = vsel %vm862_vm0, %v2091_v0, 0  ;;  %vm410_vm2 = vsmask.f32 7424  ;;  %vm749_vm4 = vcmask 130048   ;;  %vm829_vm5 = vcmask 195584  }
   0xe   : > { %1915 = vmatpush3.bf16.msra.mxu0 %v864_v4  ;;  %2024 = vmatpush3.bf16.msra.mxu1 %v864_v4  ;;  %s1760_s7 = sshll.u32 %s2732_s12, 3  ;;  %vm1550_vm6 = vcmask 1040384   ;;  %vm1552_vm7 = vcmask 1041408   ;;  %s1859_s11 = sshll.u32 %s2732_s12, 4 }
   0xf   : > { %s2172_s21 = scalar_lea.vmem %s2723_s0, %s2030_s16  ;;  %s226_s10 = scalar_lea.vmem %s2726_s3, %s1760_s7 }
  0x10   : > { %v2177_v1 = vld [vmem:[%s2172_s21 + $0x78] sm:$0xff]   ;;  %v2058_v2 = vld [vmem:[%s2172_s21 + $0x80] ss:$0 sps:$4 sm:$0x11]   ;;  %v2181_v3 = vld [vmem:[%s2172_s21 + $0x6c] sm:$0xff]   ;;  %s218_s18 = scalar_lea.vmem %s2725_s2, %s1859_s11 }
  0x11   : > { %v666_v5 = vrot.slane %v2177_v1, 1  ;;  %v667_v6 = vrot.slane %v2058_v2, 1  ;;  %v2060_v7 = vld [vmem:[%s2172_s21 + $0x74] ss:$0 sps:$4 sm:$0x11]   ;;  %v2187_v8 = vld [vmem:[%s2172_s21 + $0x18] sm:$0xff]  }
  0x12   : > { %v663_v9 = vrot.slane %v2181_v3, 1  ;;  %v2191_v10 = vld [vmem:[%s2172_s21 + $0xc] sm:$0xff]   ;;  %v664_v12 = vrot.slane %v2060_v7, 1  ;;  %v2062_v13 = vld [vmem:[%s2172_s21 + $0x20] ss:$0 sps:$4 sm:$0x11]  }
  0x13   : > { %v668_v11 = vsel %vm635_vm1, %v666_v5, %v667_v6  ;;  %v642_v14 = vrot.slane %v2187_v8, 1  ;;  %v639_v15 = vrot.slane %v2191_v10, 1  ;;  %v643_v17 = vrot.slane %v2062_v13, 1  ;;  %v2064_v18 = vld [vmem:[%s2172_s21 + $0x14] ss:$0 sps:$4 sm:$0x11]  }
  0x14   : > { %704 = vrot.lane.b32.xlu0 %v668_v11, %s2123_s22  ;;  %v665_v16 = vsel %vm635_vm1, %v663_v9, %v664_v12  ;;  %v520_v19 = vshrl.u32 %v2181_v3, 16  ;;  %v522_v20 = vshll.u32 %v2181_v3, 16  ;;  %v527_v21 = vshll.u32 %v2060_v7, 16  ;;  %v2207_v27 = vld [vmem:[%s2172_s21 + $0x84] sm:$0xff]   ;;  %v2220_v41 = vld [vmem:[%s2172_s21 + $0x90] sm:$0xff]   ;;  %v2247_v11 = vld [vmem:[%s2172_s21 + $0x9c] sm:$0xff]  }
  0x15   : > { %702 = vrot.lane.b32.xlu1 %v665_v16, %s2123_s22  ;;  %v424_v22 = vshrl.u32 %v2191_v10, 16  ;;  %v644_v23 = vsel %vm635_vm1, %v642_v14, %v643_v17  ;;  %v640_v24 = vrot.slane %v2064_v18, 1  ;;  %v426_v25 = vshll.u32 %v2191_v10, 16  ;;  %v2213_v36 = vld [vmem:[%s2172_s21 + $0x8c] ss:$0 sps:$4 sm:$0x11]  }
  0x16   : > { %v431_v26 = vshll.u32 %v2064_v18, 16  ;;  %v524_v28 = vrot.slane %v522_v20, 1  ;;  %v529_v29 = vrot.slane %v527_v21, 1  ;;  %v532_v30 = vshrl.u32 %v2177_v1, 16  ;;  %v2224_v46 = vld [vmem:[%s2172_s21 + $0x24] sm:$0xff]   ;;  %v2242_v5 = vld [vmem:[%s2172_s21 + $0x30] sm:$0xff]  }
  0x17   : > { %v534_v31 = vshll.u32 %v2177_v1, 16  ;;  %v641_v32 = vsel %vm635_vm1, %v639_v15, %v640_v24  ;;  %v428_v33 = vrot.slane %v426_v25, 1  ;;  %v539_v35 = vshll.u32 %v2058_v2, 16  ;;  %v2068_v54 = vld [vmem:[%s2172_s21 + $0x98] ss:$0 sps:$4 sm:$0x11]  }
  0x18   : > { %v433_v34 = vrot.slane %v431_v26, 1  ;;  %686 = vrot.lane.b32.xlu0 %v641_v32, %s2123_s22  ;;  %v525_v37 = vor.u32 %v524_v28, %v520_v19  ;;  %v436_v39 = vshrl.u32 %v2187_v8, 16  ;;  %v438_v40 = vshll.u32 %v2187_v8, 16  ;;  %v2239_v4 = vld [vmem:[%s2172_s21 + $0x2c] ss:$0 sps:$4 sm:$0x11]  }
  0x19   : > { %688 = vrot.lane.b32.xlu1 %v644_v23, %s2123_s22  ;;  %v536_v38 = vrot.slane %v534_v31, 1  ;;  %v429_v42 = vor.u32 %v428_v33, %v424_v22  ;;  %v541_v43 = vrot.slane %v539_v35, 1  ;;  %v443_v44 = vshll.u32 %v2062_v13, 16  ;;  %v2072_v17 = vld [vmem:[%s2172_s21 + $0x38] ss:$0 sps:$4 sm:$0x11]  }
  0x1a   : > { %v544_v45 = vshrl.u32 %v2207_v27, 16  ;;  %v530_v47 = vsel %vm410_vm2, %v525_v37, %v529_v29  ;;  %v440_v49 = vrot.slane %v438_v40, 1  ;;  %v546_v50 = vshll.u32 %v2207_v27, 16  ;;  %v2259_v25 = vld [vmem:[%s2172_s21 + $0xa4] ss:$0 sps:$4 sm:$0x11]  }
  0x1b   : > { %v537_v48 = vor.u32 %v536_v38, %v532_v30  ;;  %v434_v51 = vsel %vm410_vm2, %v429_v42, %v433_v34  ;;  %v445_v52 = vrot.slane %v443_v44, 1  ;;  %v551_v53 = vshll.u32 %v2213_v36, 16  ;;  %v2269_v35 = vld [vmem:[%s2172_s21 + $0xa8] sm:$0xff]   ;;  %v2280_v44 = vld [vmem:[%s2172_s21 + $0x3c] sm:$0xff]  }
  0x1c   : > { %v556_v55 = vshrl.u32 %v2220_v41, 16  ;;  %621 = vrot.lane.b32.xlu0 %v530_v47, %s2124_s23  ;;  %v441_v56 = vor.u32 %v440_v49, %v436_v39  ;;  %v548_v57 = vrot.slane %v546_v50, 1  ;;  %v558_v58 = vshll.u32 %v2220_v41, 16  ;;  %v2275_v39 = vld [vmem:[%s2172_s21 + $0xb0] ss:$0 sps:$4 sm:$0x11]  }
  0x1d   : > { %605 = vrot.lane.b32.xlu1 %v434_v51, %s2124_s23  ;;  %v542_v59 = vsel %vm410_vm2, %v537_v48, %v541_v43  ;;  %v553_v60 = vrot.slane %v551_v53, 1  ;;  %v563_v61 = vshll.u32 %v2068_v54, 16  ;;  %v669_v2 = vrot.slane %v2207_v27, 1 }
  0x1e   : > { %v446_v62 = vsel %vm410_vm2, %v441_v56, %v445_v52  ;;  %v549_v63 = vor.u32 %v548_v57, %v544_v45  ;;  %v560_v0 = vrot.slane %v558_v58, 1  ;;  %v448_v7 = vshrl.u32 %v2224_v46, 16  ;;  %v2289_v52 = vld [vmem:[%s2172_s21 + $0x44] ss:$0 sps:$4 sm:$0x11]  }
  0x1f   : > { %v565_v6 = vrot.slane %v563_v61, 1  ;;  %v450_v9 = vshll.u32 %v2224_v46, 16  ;;  %v670_v13 = vrot.slane %v2213_v36, 1  ;;  %v455_v14 = vshll.u32 %v2239_v4, 16 }
  0x20   : > { %623 = vrot.lane.b32.xlu0 %v542_v59, %s2124_s23  ;;  %v561_v12 = vor.u32 %v560_v0, %v556_v55  ;;  %v554_v15 = vsel %vm410_vm2, %v549_v63, %v553_v60  ;;  %v460_v18 = vshrl.u32 %v2242_v5, 16  ;;  %v462_v19 = vshll.u32 %v2242_v5, 16  ;;  %v2299_v61 = vld [vmem:[%s2172_s21 + $0x50] ss:$0 sps:$4 sm:$0x11]  }
  0x21   : > { %607 = vrot.lane.b32.xlu1 %v446_v62, %s2124_s23  ;;  %v452_v16 = vrot.slane %v450_v9, 1  ;;  %v457_v21 = vrot.slane %v455_v14, 1  ;;  %v467_v24 = vshll.u32 %v2072_v17, 16  ;;  %v672_v26 = vrot.slane %v2220_v41, 1 }
  0x22   : > { %v566_v20 = vsel %vm410_vm2, %v561_v12, %v565_v6  ;;  %v464_v23 = vrot.slane %v462_v19, 1  ;;  %v673_v28 = vrot.slane %v2068_v54, 1  ;;  %v645_v29 = vrot.slane %v2224_v46, 1  ;;  %v2293_v54 = vld [vmem:[%s2172_s21 + $0x48] sm:$0xff]   ;;  %v2307_v6 = vld [vmem:[%s2172_s21 + $0xb4] sm:$0xff]  }
  0x23   : > { %v453_v22 = vor.u32 %v452_v16, %v448_v7  ;;  %v570_v30 = vshll.u32 %v2247_v11, 16  ;;  %v671_v31 = vsel %vm635_vm1, %v669_v2, %v670_v13  ;;  %v469_v34 = vrot.slane %v467_v24, 1 }
  0x24   : > { %625 = vrot.lane.b32.xlu0 %v554_v15, %s2124_s23  ;;  %v465_v33 = vor.u32 %v464_v23, %v460_v18  ;;  %v646_v36 = vrot.slane %v2239_v4, 1  ;;  %v648_v37 = vrot.slane %v2242_v5, 1  ;;  %v568_v38 = vshrl.u32 %v2247_v11, 16  ;;  %v2082_v18 = vld [vmem:[%s2172_s21 + $0xbc] ss:$0 sps:$4 sm:$0x11]  }
  0x25   : > { %627 = vrot.lane.b32.xlu1 %v566_v20, %s2124_s23  ;;  %v458_v32 = vsel %vm410_vm2, %v453_v22, %v457_v21  ;;  %v572_v40 = vrot.slane %v570_v30, 1  ;;  %v575_v42 = vshll.u32 %v2259_v25, 16  ;;  %v582_v43 = vshll.u32 %v2269_v35, 16  ;;  %v2319_v20 = vld [vmem:[%s2172_s21 + $0xc0] sm:$0xff]  }
  0x26   : > { %v674_v45 = vsel %vm635_vm1, %v672_v26, %v673_v28  ;;  %v580_v47 = vshrl.u32 %v2269_v35, 16  ;;  %v587_v48 = vshll.u32 %v2275_v39, 16  ;;  %v470_v49 = vsel %vm410_vm2, %v465_v33, %v469_v34  ;;  %v2322_v21 = vld [vmem:[%s2172_s21 + $0xc8] ss:$0 sps:$4 sm:$0x11]   ;;  %v2331_v26 = vld [vmem:[%s2172_s21 + $0x54] sm:$0xff]  }
  0x27   : > { %v649_v50 = vrot.slane %v2072_v17, 1  ;;  %v584_v51 = vrot.slane %v582_v43, 1  ;;  %v474_v53 = vshll.u32 %v2280_v44, 16  ;;  %v573_v55 = vor.u32 %v572_v40, %v568_v38  ;;  %v2339_v38 = vld [vmem:[%s2172_s21 + $0x5c] ss:$0 sps:$4 sm:$0x11]  }
  0x28   : > { %706 = vrot.lane.b32.xlu0 %v671_v31, %s2123_s22  ;;  %v577_v56 = vrot.slane %v575_v42, 1  ;;  %v589_v58 = vrot.slane %v587_v48, 1  ;;  %v472_v59 = vshrl.u32 %v2280_v44, 16  ;;  %v647_v62 = vsel %vm635_vm1, %v645_v29, %v646_v36 }
  0x29   : > { %609 = vrot.lane.b32.xlu1 %v458_v32, %s2124_s23  ;;  %v585_v57 = vor.u32 %v584_v51, %v580_v47  ;;  %v476_v60 = vrot.slane %v474_v53, 1  ;;  %v650_v63 = vsel %vm635_vm1, %v648_v37, %v649_v50  ;;  %v479_v0 = vshll.u32 %v2289_v52, 16  ;;  %v2354_v53 = vld [vmem:[%s2172_s21] sm:$0xff]  }
  0x2a   : > { %v486_v2 = vshll.u32 %v2293_v54, 16  ;;  %v675_v4 = vrot.slane %v2247_v11, 1  ;;  %v578_v7 = vsel %vm410_vm2, %v573_v55, %v577_v56  ;;  %v676_v12 = vrot.slane %v2259_v25, 1 }
  0x2b   : > { %v590_v9 = vsel %vm410_vm2, %v585_v57, %v589_v58  ;;  %v484_v13 = vshrl.u32 %v2293_v54, 16  ;;  %v477_v14 = vor.u32 %v476_v60, %v472_v59  ;;  %v481_v15 = vrot.slane %v479_v0, 1  ;;  %v2359_v59 = vld [vmem:[%s2172_s21 + $0x8] ss:$0 sps:$4 sm:$0x11]  }
  0x2c   : > { %708 = vrot.lane.b32.xlu0 %v674_v45, %s2123_s22  ;;  %v488_v16 = vrot.slane %v486_v2, 1  ;;  %v491_v17 = vshll.u32 %v2299_v61, 16  ;;  %v594_v19 = vshll.u32 %v2307_v6, 16  ;;  %v677_v22 = vsel %vm635_vm1, %v675_v4, %v676_v12  ;;  %v2088_v0 = vld [vmem:[%s2172_s21 + $0x68] ss:$0 sps:$4 sm:$0x11]  }
  0x2d   : > { %611 = vrot.lane.b32.xlu1 %v470_v49, %s2124_s23  ;;  %v678_v23 = vrot.slane %v2269_v35, 1  ;;  %v679_v24 = vrot.slane %v2275_v39, 1  ;;  %v651_v25 = vrot.slane %v2280_v44, 1  ;;  %v482_v28 = vsel %vm410_vm2, %v477_v14, %v481_v15  ;;  %v2350_v49 = vld [vmem:[%s2172_s21 + $0x60] sm:$0xff]   ;;  %v2374_v12 = vld [vmem:[%s2172_s21 + $0xcc] sm:$0xff]  }
  0x2e   : > { %v489_v29 = vor.u32 %v488_v16, %v484_v13  ;;  %v493_v30 = vrot.slane %v491_v17, 1  ;;  %v652_v31 = vrot.slane %v2289_v52, 1  ;;  %v592_v32 = vshrl.u32 %v2307_v6, 16  ;;  %v2093_v13 = vld [vmem:[%s2172_s21 + $0xd4] ss:$0 sps:$4 sm:$0x11]  }
  0x2f   : > { %v596_v33 = vrot.slane %v594_v19, 1  ;;  %v599_v34 = vshll.u32 %v2082_v18, 16  ;;  %v796_v36 = vshll.u32 %v2319_v20, 16  ;;  %v801_v37 = vshll.u32 %v2322_v21, 16  ;;  %v2095_v14 = vld [vmem:[%s2724_s1 + $0x8] ss:$0 sps:$4 sm:$0xff]  }
  0x30   : > { %690 = vrot.lane.b32.xlu0 %v647_v62, %s2123_s22  ;;  %v654_v39 = vrot.slane %v2293_v54, 1  ;;  %v655_v40 = vrot.slane %v2299_v61, 1  ;;  %v681_v42 = vrot.slane %v2307_v6, 1  ;;  %v498_v43 = vshll.u32 %v2331_v26, 16  ;;  %v2096_v19 = vld [vmem:[%s2724_s1 + $0x20] ss:$0 sps:$4 sm:$0xff]  }
  0x31   : > { %692 = vrot.lane.b32.xlu1 %v650_v63, %s2123_s22  ;;  %v680_v45 = vsel %vm635_vm1, %v678_v23, %v679_v24  ;;  %v494_v47 = vsel %vm410_vm2, %v489_v29, %v493_v30  ;;  %v682_v48 = vrot.slane %v2082_v18, 1  ;;  %v601_v50 = vrot.slane %v599_v34, 1 }
  0x32   : > { %v794_v51 = vshrl.u32 %v2319_v20, 16  ;;  %v798_v52 = vrot.slane %v796_v36, 1  ;;  %v597_v55 = vor.u32 %v596_v33, %v592_v32  ;;  %v803_v56 = vrot.slane %v801_v37, 1 }
  0x33   : > { %v496_v57 = vshrl.u32 %v2331_v26, 16  ;;  %v503_v58 = vshll.u32 %v2339_v38, 16  ;;  %v500_v60 = vrot.slane %v498_v43, 1  ;;  %v636_v61 = vrot.slane %v2354_v53, 1 }
  0x34   : > { %629 = vrot.lane.b32.xlu0 %v578_v7, %s2124_s23  ;;  %v653_v62 = vsel %vm635_vm1, %v651_v25, %v652_v31  ;;  %v656_v63 = vsel %vm635_vm1, %v654_v39, %v655_v40  ;;  %v510_v2 = vshll.u32 %v2350_v49, 16  ;;  %v637_v4 = vrot.slane %v2359_v59, 1  ;;  %v2094_v7 = vld [vmem:[%s2724_s1 + $0xc] sm:$0xff]  }
  0x35   : > { %631 = vrot.lane.b32.xlu1 %v590_v9, %s2124_s23  ;;  %v683_v9 = vsel %vm635_vm1, %v681_v42, %v682_v48  ;;  %v602_v15 = vsel %vm410_vm2, %v597_v55, %v601_v50  ;;  %v799_v16 = vor.u32 %v798_v52, %v794_v51  ;;  %v505_v17 = vrot.slane %v503_v58, 1  ;;  %1916 = vmatprep.subr.bf16.mxu0 %v2094_v7 }
  0x36   : > { %v638_v18 = vsel %vm635_vm1, %v636_v61, %v637_v4  ;;  %2023 = vmatprep.subr.bf16.mxu1 %v2094_v7  ;;  %v508_v23 = vshrl.u32 %v2350_v49, 16  ;;  %v1224_v24 = vrot.slane %v2374_v12, 1  ;;  %v1225_v25 = vrot.slane %v2093_v13, 1  ;;  %1917 = vmatpush3.bf16.msra.mxu0 %v2094_v7 }
  0x37   : > { %v515_v29 = vshll.u32 %v2088_v0, 16  ;;  %2025 = vmatpush3.bf16.msra.mxu1 %v2094_v7  ;;  %v2390_v30 = vsel %vm862_vm0, %v2095_v14, 0  ;;  %v2393_v31 = vsel %vm862_vm0, %v2096_v19, 0  ;;  %2029 = vmatprep.subr.msk.bf16.mxu0 %vm862_vm0, %v2096_v19  ;;  %v807_v33 = vrot.slane %v2319_v20, 1 }
  0x38   : > { %710 = vrot.lane.b32.xlu0 %v677_v22, %s2123_s22  ;;  %v501_v22 = vor.u32 %v500_v60, %v496_v57  ;;  %v1226_v32 = vsel %vm635_vm1, %v1224_v24, %v1225_v25  ;;  %2028 = vmatprep.subr.msk.bf16.mxu1 %vm862_vm0, %v2095_v14  ;;  %v808_v34 = vrot.slane %v2322_v21, 1  ;;  %v414_v36 = vshll.u32 %v2354_v53, 16  ;;  %v2097_v25 = vld [vmem:[%s2724_s1] sm:$0xff]  }
  0x39   : > { %613 = vrot.lane.b32.xlu1 %v482_v28, %s2124_s23  ;;  %v512_v28 = vrot.slane %v510_v2, 1  ;;  %v804_v37 = vsel %vm410_vm2, %v799_v16, %v803_v56  ;;  %v517_v42 = vrot.slane %v515_v29, 1  ;;  %v657_v43 = vrot.slane %v2331_v26, 1 }
  0x3a   : > { %v506_v39 = vsel %vm410_vm2, %v501_v22, %v505_v17  ;;  %v661_v48 = vrot.slane %v2088_v0, 1  ;;  %v412_v21 = vshrl.u32 %v2354_v53, 16  ;;  %v416_v50 = vrot.slane %v414_v36, 1 }
  0x3b   : > { %v513_v40 = vor.u32 %v512_v28, %v508_v23  ;;  %v809_v51 = vsel %vm635_vm1, %v807_v33, %v808_v34  ;;  %v419_v55 = vshll.u32 %v2359_v59, 16  ;;  %v1213_v56 = vshll.u32 %v2374_v12, 16  ;;  %v2098_v28 = vld [vmem:[%s2724_s1 + $0x18] sm:$0xff]  }
  0x3c   : > { %712 = vrot.lane.b32.xlu0 %v680_v45, %s2123_s22  ;;  %v658_v45 = vrot.slane %v2339_v38, 1  ;;  %v417_v58 = vor.u32 %v416_v50, %v412_v21  ;;  %v1211_v61 = vshrl.u32 %v2374_v12, 16 }
  0x3d   : > { %615 = vrot.lane.b32.xlu1 %v494_v47, %s2124_s23  ;;  %v660_v47 = vrot.slane %v2350_v49, 1  ;;  %v518_v52 = vsel %vm410_vm2, %v513_v40, %v517_v42  ;;  %v421_v60 = vrot.slane %v419_v55, 1 }
  0x3e   : > { %v659_v38 = vsel %vm635_vm1, %v657_v43, %v658_v45 }
  0x3f   : > { %v662_v57 = vsel %vm635_vm1, %v660_v47, %v661_v48  ;;  %v422_v59 = vsel %vm410_vm2, %v417_v58, %v421_v60 }
  0x40   : > { %694 = vrot.lane.b32.xlu0 %v653_v62, %s2123_s22  ;;  %v1215_v62 = vrot.slane %v1213_v56, 1 }
  0x41   : > { %696 = vrot.lane.b32.xlu1 %v656_v63, %s2123_s22  ;;  %v1218_v63 = vshll.u32 %v2093_v13, 16 }
  0x42   : > { %v1216_v0 = vor.u32 %v1215_v62, %v1211_v61 }
  0x43   : > { %v1220_v2 = vrot.slane %v1218_v63, 1 }
  0x44   : > { %633 = vrot.lane.b32.xlu0 %v602_v15, %s2124_s23 }
  0x45   : > { %714 = vrot.lane.b32.xlu1 %v683_v9, %s2123_s22  ;;  %v1221_v4 = vsel %vm410_vm2, %v1216_v0, %v1220_v2 }
  0x48   : > { %805 = vrot.lane.b32.xlu0 %v804_v37, %s2124_s23 }
  0x49   : > { %617 = vrot.lane.b32.xlu1 %v506_v39, %s2124_s23 }
  0x4c   : > { %810 = vrot.lane.b32.xlu0 %v809_v51, %s2123_s22 }
  0x4d   : > { %619 = vrot.lane.b32.xlu1 %v518_v52, %s2124_s23 }
  0x50   : > { %698 = vrot.lane.b32.xlu0 %v659_v38, %s2123_s22 }
  0x51   : > { %700 = vrot.lane.b32.xlu1 %v662_v57, %s2123_s22 }
  0x54   : > { %603 = vrot.lane.b32.xlu0 %v422_v59, %s2124_s23 }
  0x55   : > { %684 = vrot.lane.b32.xlu1 %v638_v18, %s2123_s22 }
  0x58   : > { %1222 = vrot.lane.b32.xlu0 %v1221_v4, %s2124_s23 }
  0x59   : > { %1227 = vrot.lane.b32.xlu1 %v1226_v32, %s2123_s22 }
  0x86   : > { %v705_v7 = vpop.permute.xlu0 %704 }
  0x87   : > { %v703_v9 = vpop.permute.xlu1 %702 }
  0x8a   : > { %v687_v14 = vpop.permute.xlu0 %686 }
  0x8b   : > { %v689_v13 = vpop.permute.xlu1 %688 }
  0x8e   : > { %v622_v15 = vpop.permute.xlu0 %621 }
  0x8f   : > { %v606_v16 = vpop.permute.xlu1 %605  ;;  %v736_v17 = vsel %vm716_vm3, %v2181_v3, %v622_v15 }
  0x90   : > { %v720_v18 = vsel %vm716_vm3, %v2191_v10, %v606_v16  ;;  %v2436_v22 = vsel %vm749_vm4, %v736_v17, %v703_v9 }
  0x91   : > { %v2433_v19 = vsel %vm749_vm4, %v720_v18, %v687_v14  ;;  %1934 = vmatprep.mubr.msk.bf16.mxu1 %vm829_vm5, %v2436_v22 }
  0x92   : > { %1918 = vmatprep.mubr.msk.bf16.mxu0 %vm829_vm5, %v2433_v19  ;;  %v624_v23 = vpop.permute.xlu0 %623 }
  0x93   : > { %v608_v24 = vpop.permute.xlu1 %607  ;;  %v738_v3 = vsel %vm716_vm3, %v2177_v1, %v624_v23 }
  0x94   : > { %v722_v10 = vsel %vm716_vm3, %v2187_v8, %v608_v24  ;;  %v2456_v32 = vsel %vm749_vm4, %v738_v3, %v705_v7 }
  0x95   : > { %v2453_v29 = vsel %vm749_vm4, %v722_v10, %v689_v13  ;;  %1935 = vmatmul.mubr.msk.bf16.vlgmr.msra.gmra.mxu1 %vm829_vm5, %v2456_v32 }
  0x96   : > { %1919 = vmatmul.mubr.msk.bf16.vlgmr.msra.gmra.mxu0 %vm829_vm5, %v2453_v29  ;;  %v626_v1 = vpop.permute.xlu0 %625  ;;  %1951 = vmatpush3.bf16.msra.mxu1 %v2390_v30 }
  0x97   : > { %v628_v8 = vpop.permute.xlu1 %627  ;;  %1987 = vmatpush3.bf16.msra.mxu0 %v2393_v31  ;;  %1952 = vmatprep.subr.bf16.mxu1 %v2097_v25  ;;  %v740_v33 = vsel %vm716_vm3, %v2207_v27, %v626_v1 }
  0x98   : > { %1988 = vmatprep.subr.bf16.mxu0 %v2098_v28  ;;  %v742_v30 = vsel %vm716_vm3, %v2220_v41, %v628_v8 }
  0x9a   : > { %v707_v34 = vpop.permute.xlu0 %706  ;;  %1953 = vmatpush3.bf16.msra.mxu1 %v2097_v25 }
  0x9b   : > { %v610_v36 = vpop.permute.xlu1 %609  ;;  %1989 = vmatpush3.bf16.msra.mxu0 %v2098_v28  ;;  %v2467_v37 = vsel %vm749_vm4, %v740_v33, %v707_v34 }
  0x9c   : > { %1938 = vmatprep.mubr.msk.bf16.mxu1 %vm829_vm5, %v2467_v37  ;;  %v724_v27 = vsel %vm716_vm3, %v2224_v46, %v610_v36 }
  0x9e   : > { %v709_v39 = vpop.permute.xlu0 %708 }
  0x9f   : > { %v612_v31 = vpop.permute.xlu1 %611  ;;  %v2474_v40 = vsel %vm749_vm4, %v742_v30, %v709_v39 }
  0xa0   : > { %1939 = vmatmul.mubr.msk.bf16.gmra.mxu1 %vm829_vm5, %v2474_v40  ;;  %v726_v42 = vsel %vm716_vm3, %v2242_v5, %v612_v31 }
  0xa2   : > { %v691_v43 = vpop.permute.xlu0 %690 }
  0xa3   : > { %v693_v45 = vpop.permute.xlu1 %692  ;;  %v757_v47 = vsel %vm749_vm4, %v724_v27, %v691_v43 }
  0xa4   : > { %v759_v41 = vsel %vm749_vm4, %v726_v42, %v693_v45  ;;  %1922 = vmatprep.mubr.msk.bf16.mxu0 %vm829_vm5, %v757_v47 }
  0xa5   : > { %1923 = vmatmul.mubr.msk.bf16.gmra.mxu0 %vm829_vm5, %v759_v41 }
  0xa6   : > { %v630_v48 = vpop.permute.xlu0 %629 }
  0xa7   : > { %v632_v21 = vpop.permute.xlu1 %631  ;;  %v744_v50 = vsel %vm716_vm3, %v2247_v11, %v630_v48 }
  0xa8   : > { %v746_v5 = vsel %vm716_vm3, %v2269_v35, %v632_v21 }
  0xaa   : > { %v711_v51 = vpop.permute.xlu0 %710 }
  0xab   : > { %v614_v46 = vpop.permute.xlu1 %613  ;;  %v2489_v52 = vsel %vm749_vm4, %v744_v50, %v711_v51 }
  0xac   : > { %1942 = vmatprep.mubr.msk.bf16.mxu1 %vm829_vm5, %v2489_v52  ;;  %v728_v11 = vsel %vm716_vm3, %v2280_v44, %v614_v46 }
  0xae   : > { %v713_v55 = vpop.permute.xlu0 %712 }
  0xaf   : > { %v616_v56 = vpop.permute.xlu1 %615  ;;  %v2496_v38 = vsel %vm749_vm4, %v746_v5, %v713_v55 }
  0xb0   : > { %1943 = vmatmul.mubr.msk.bf16.gmra.mxu1 %vm829_vm5, %v2496_v38  ;;  %v730_v57 = vsel %vm716_vm3, %v2293_v54, %v616_v56 }
  0xb2   : > { %v695_v58 = vpop.permute.xlu0 %694 }
  0xb3   : > { %v697_v60 = vpop.permute.xlu1 %696  ;;  %v761_v61 = vsel %vm749_vm4, %v728_v11, %v695_v58 }
  0xb4   : > { %v763_v35 = vsel %vm749_vm4, %v730_v57, %v697_v60  ;;  %1926 = vmatprep.mubr.msk.bf16.mxu0 %vm829_vm5, %v761_v61 }
  0xb5   : > { %1927 = vmatmul.mubr.msk.bf16.gmra.mxu0 %vm829_vm5, %v763_v35 }
  0xb6   : > { %v634_v62 = vpop.permute.xlu0 %633 }
  0xb7   : > { %v715_v63 = vpop.permute.xlu1 %714  ;;  %v748_v59 = vsel %vm716_vm3, %v2307_v6, %v634_v62 }
  0xb8   : > { %v781_v44 = vsel %vm749_vm4, %v748_v59, %v715_v63 }
  0xb9   : > { %1946 = vmatprep.mubr.msk.bf16.mxu1 %vm829_vm5, %v781_v44 }
  0xba   : > { %v806_v54 = vpop.permute.xlu0 %805 }
  0xbb   : > { %v618_v0 = vpop.permute.xlu1 %617  ;;  %v813_v2 = vsel %vm716_vm3, %v2319_v20, %v806_v54 }
  0xbc   : > { %v732_v13 = vsel %vm716_vm3, %v2331_v26, %v618_v0 }
  0xbe   : > { %v811_v4 = vpop.permute.xlu0 %810 }
  0xbf   : > { %v620_v7 = vpop.permute.xlu1 %619  ;;  %v815_v9 = vsel %vm749_vm4, %v813_v2, %v811_v4 }
  0xc0   : > { %1947 = vmatmul.mubr.msk.bf16.gmra.mxu1 %vm829_vm5, %v815_v9  ;;  %v734_v6 = vsel %vm716_vm3, %v2350_v49, %v620_v7 }
  0xc2   : > { %v699_v14 = vpop.permute.xlu0 %698 }
  0xc3   : > { %v701_v15 = vpop.permute.xlu1 %700  ;;  %v765_v16 = vsel %vm749_vm4, %v732_v13, %v699_v14 }
  0xc4   : > { %v767_v17 = vsel %vm749_vm4, %v734_v6, %v701_v15  ;;  %1930 = vmatprep.mubr.msk.bf16.mxu0 %vm829_vm5, %v765_v16 }
  0xc5   : > { %1931 = vmatmul.mubr.msk.bf16.gmra.mxu0 %vm829_vm5, %v767_v17 }
  0xc6   : > { %1990 = vmatprep.mubr.msk.bf16.mxu0 %vm829_vm5, %v2453_v29  ;;  %v604_v20 = vpop.permute.xlu0 %603 }
  0xc7   : > { %v685_v18 = vpop.permute.xlu1 %684  ;;  %v718_v26 = vsel %vm716_vm3, %v2354_v53, %v604_v20 }
  0xc8   : > { %v751_v49 = vsel %vm749_vm4, %v718_v26, %v685_v18 }
  0xc9   : > { %1954 = vmatprep.mubr.msk.bf16.mxu1 %vm829_vm5, %v751_v49 }
  0xca   : > { %1955 = vmatmul.mubr.msk.bf16.vlgmr.msra.gmra.mxu1 %vm829_vm5, %v2433_v19  ;;  %v1223_v23 = vpop.permute.xlu0 %1222 }
  0xcb   : > { %v1228_v24 = vpop.permute.xlu1 %1227  ;;  %1958 = vmatprep.mubr.msk.bf16.mxu1 %vm829_vm5, %v2453_v29  ;;  %v1230_v3 = vsel %vm716_vm3, %v2374_v12, %v1223_v23 }
  0xcc   : > { %v1232_v10 = vsel %vm749_vm4, %v1230_v3, %v1228_v24 }
  0xcd   : > { %1991 = vmatmul.mubr.msk.bf16.vlgmr.msra.gmra.mxu0 %vm829_vm5, %v757_v47 }
  0xce   : > { %1994 = vmatprep.mubr.msk.bf16.mxu0 %vm829_vm5, %v759_v41 }
  0xd2   : > { %1959 = vmatmul.mubr.msk.bf16.gmra.mxu1 %vm829_vm5, %v757_v47 }
  0xd3   : > { %1962 = vmatprep.mubr.msk.bf16.mxu1 %vm829_vm5, %v759_v41 }
  0xd5   : > { %1995 = vmatmul.mubr.msk.bf16.gmra.mxu0 %vm829_vm5, %v761_v61 }
  0xd6   : > { %1998 = vmatprep.mubr.msk.bf16.mxu0 %vm829_vm5, %v763_v35 }
  0xda   : > { %1963 = vmatmul.mubr.msk.bf16.gmra.mxu1 %vm829_vm5, %v761_v61 }
  0xdb   : > { %1966 = vmatprep.mubr.msk.bf16.mxu1 %vm829_vm5, %v763_v35 }
  0xdd   : > { %1999 = vmatmul.mubr.msk.bf16.gmra.mxu0 %vm829_vm5, %v765_v16 }
  0xde   : > { %2002 = vmatprep.mubr.msk.bf16.mxu0 %vm829_vm5, %v767_v17 }
  0xe2   : > { %1967 = vmatmul.mubr.msk.bf16.gmra.mxu1 %vm829_vm5, %v765_v16 }
  0xe3   : > { %1970 = vmatprep.mubr.msk.bf16.mxu1 %vm829_vm5, %v767_v17 }
  0xe5   : > { %2003 = vmatmul.mubr.msk.bf16.gmra.mxu0 %vm829_vm5, %v2436_v22 }
  0xe6   : > { %2006 = vmatprep.mubr.msk.bf16.mxu0 %vm829_vm5, %v2456_v32 }
  0xea   : > { %1971 = vmatmul.mubr.msk.bf16.gmra.mxu1 %vm829_vm5, %v2436_v22 }
  0xeb   : > { %1974 = vmatprep.mubr.msk.bf16.mxu1 %vm829_vm5, %v2456_v32 }
  0xed   : > { %2007 = vmatmul.mubr.msk.bf16.gmra.mxu0 %vm829_vm5, %v2467_v37 }
  0xee   : > { %2010 = vmatprep.mubr.msk.bf16.mxu0 %vm829_vm5, %v2474_v40 }
  0xf2   : > { %1975 = vmatmul.mubr.msk.bf16.gmra.mxu1 %vm829_vm5, %v2467_v37 }
  0xf3   : > { %1978 = vmatprep.mubr.msk.bf16.mxu1 %vm829_vm5, %v2474_v40 }
  0xf5   : > { %2011 = vmatmul.mubr.msk.bf16.gmra.mxu0 %vm829_vm5, %v2489_v52 }
  0xf6   : > { %2014 = vmatprep.mubr.msk.bf16.mxu0 %vm829_vm5, %v2496_v38 }
  0xfa   : > { %1979 = vmatmul.mubr.msk.bf16.gmra.mxu1 %vm829_vm5, %v2489_v52 }
  0xfb   : > { %1982 = vmatprep.mubr.msk.bf16.mxu1 %vm829_vm5, %v2496_v38 }
  0xfd   : > { %2015 = vmatmul.mubr.msk.bf16.gmra.mxu0 %vm829_vm5, %v781_v44 }
  0xfe   : > { %2018 = vmatprep.mubr.msk.bf16.mxu0 %vm829_vm5, %v815_v9 }
 0x102   : > { %1983 = vmatmul.mubr.msk.bf16.gmra.mxu1 %vm829_vm5, %v781_v44 }
 0x105   : > { %2019 = vmatmul.mubr.msk.bf16.gmra.mxu0 %vm829_vm5, %v1232_v10 }
 0x155   : > { %v2577_v53 = vpop.f32.mrf.mxu1 }
 0x156   : > { %v1920_v19 = vpop.f32.mrf.mxu0 }
 0x157   : > { %v2579_v12 = vpop.f32.mrf.mxu1 }
 0x158   : > { %v900_v25 = vpop.f32.mrf.mxu0 }
 0x159   : > { %v2581_v22 = vpop.f32.mrf.mxu1 }
 0x15a   : > { %v1921_v29 = vpop.f32.mrf.mxu0 }
 0x15b   : > { %v2583_v28 = vpop.f32.mrf.mxu1 }
 0x15c   : > { %v903_v1 = vpop.f32.mrf.mxu0 }
 0x160   : > { %v2585_v32 = vpop.f32.mrf.mxu1 }
 0x162   : > { %v2587_v8 = vpop.f32.mrf.mxu1 }
 0x164   : > { %v2589_v34 = vpop.f32.mrf.mxu1 }
 0x165   : > { %v1924_v33 = vpop.f32.mrf.mxu0 }
 0x166   : > { %v2591_v37 = vpop.f32.mrf.mxu1 }
 0x167   : > { %v916_v36 = vpop.f32.mrf.mxu0 }
 0x169   : > { %v1925_v30 = vpop.f32.mrf.mxu0 }
 0x16b   : > { %v919_v31 = vpop.f32.mrf.mxu0 }
 0x170   : > { %v2593_v39 = vpop.f32.mrf.mxu1 }
 0x172   : > { %v2595_v40 = vpop.f32.mrf.mxu1 }
 0x174   : > { %v2599_v42 = vpop.f32.mrf.mxu1 }
 0x175   : > { %v2597_v27 = vpop.f32.mrf.mxu0 }
 0x176   : > { %v2601_v45 = vpop.f32.mrf.mxu1 }
 0x177   : > { %v932_v43 = vpop.f32.mrf.mxu0 }
 0x179   : > { %v2603_v47 = vpop.f32.mrf.mxu0 }
 0x17b   : > { %v2609_v21 = vpop.f32.mrf.mxu0 }
 0x180   : > { %v2605_v41 = vpop.f32.mrf.mxu1 }
 0x182   : > { %v2607_v48 = vpop.f32.mrf.mxu1 }
 0x184   : > { %v2611_v50 = vpop.f32.mrf.mxu1 }
 0x185   : > { %v2613_v51 = vpop.f32.mrf.mxu0 }
 0x186   : > { %v2617_v52 = vpop.f32.mrf.mxu1 }
 0x187   : > { %v2615_v46 = vpop.f32.mrf.mxu0 }
 0x189   : > { %v2619_v5 = vpop.f32.mrf.mxu0 }
 0x18a   : > { %v1956_v55 = vpop.f32.mrf.mxu1 }
 0x18b   : > { %v2621_v56 = vpop.f32.mrf.mxu0  ;;  %v1084_v61 = vadd.f32 %v1956_v55, %v1920_v19 }
 0x18c   : > { %v1075_v38 = vpop.f32.mrf.mxu1 }
 0x18d   : > { %v1076_v11 = vadd.f32 %v1075_v38, %v900_v25  ;;  %v1992_v57 = vpop.f32.mrf.mxu0 }
 0x18e   : > { %v1957_v58 = vpop.f32.mrf.mxu1  ;;  %v1414_v2 = vadd.f32 %v1992_v57, %v1084_v61 }
 0x18f   : > { %v1285_v60 = vpop.f32.mrf.mxu0  ;;  %v1087_v44 = vadd.f32 %v1957_v58, %v1921_v29 }
 0x190   : > { %v1412_v35 = vadd.f32 %v1285_v60, %v1076_v11  ;;  %v1078_v62 = vpop.f32.mrf.mxu1  ;;  %v1483_v26 = vmul.f32 %v1414_v2, %v1414_v2 }
 0x191   : > { %v1079_v63 = vadd.f32 %v1078_v62, %v903_v1  ;;  %v1993_v59 = vpop.f32.mrf.mxu0 }
 0x192   : > { %v1960_v54 = vpop.f32.mrf.mxu1  ;;  %1555 = vxpose.xlu0.b32.start [1/16] (narrow) %v1412_v35, 8  ;;  %v1481_v6 = vmul.f32 %v1412_v35, %v1412_v35  ;;  %v1415_v14 = vadd.f32 %v1993_v59, %v1087_v44 }
 0x193   : > { %v1288_v0 = vpop.f32.mrf.mxu0  ;;  %v1100_v20 = vadd.f32 %v1960_v54, %v1924_v33 }
 0x194   : > { %v1413_v4 = vadd.f32 %v1288_v0, %v1079_v63  ;;  %v1091_v7 = vpop.f32.mrf.mxu1  ;;  %v1484_v25 = vmul.f32 %v1415_v14, %v1415_v14 }
 0x195   : > { %v1092_v9 = vadd.f32 %v1091_v7, %v916_v36  ;;  %v1996_v13 = vpop.f32.mrf.mxu0 }
 0x196   : > { %v1444_v15 = vadd.f32 %v1413_v4, %v1412_v35  ;;  %v1482_v16 = vmul.f32 %v1413_v4, %v1413_v4  ;;  %v1961_v17 = vpop.f32.mrf.mxu1  ;;  %1556 = vxpose.xlu0.b32.cont [2/16] (narrow) %v1413_v4, 8  ;;  %v1418_v38 = vadd.f32 %v1996_v13, %v1100_v20 }
 0x197   : > { %v1301_v18 = vpop.f32.mrf.mxu0  ;;  %v1103_v1 = vadd.f32 %v1961_v17, %v1925_v30 }
 0x198   : > { %v1445_v49 = vadd.f32 %v1444_v15, %v1414_v2  ;;  %v1513_v23 = vadd.f32 %v1482_v16, %v1481_v6  ;;  %v1416_v24 = vadd.f32 %v1301_v18, %v1092_v9  ;;  %v1094_v3 = vpop.f32.mrf.mxu1 }
 0x199   : > { %v1095_v10 = vadd.f32 %v1094_v3, %v919_v31  ;;  %v1997_v19 = vpop.f32.mrf.mxu0 }
 0x19a   : > { %v1514_v29 = vadd.f32 %v1513_v23, %v1483_v26  ;;  %v1446_v36 = vadd.f32 %v1445_v49, %v1415_v14  ;;  %v1964_v55 = vpop.f32.mrf.mxu1  ;;  %1557 = vxpose.xlu0.b32.cont [3/16] (narrow) %v1414_v2, 8  ;;  %v1485_v58 = vmul.f32 %v1416_v24, %v1416_v24  ;;  %v2623_v59 = vadd.f32 %v1997_v19, %v1103_v1 }
 0x19b   : > { %v1304_v11 = vpop.f32.mrf.mxu0  ;;  %v1116_v30 = vadd.f32 %v1964_v55, %v2597_v27  ;;  %v1487_v2 = vmul.f32 %v1418_v38, %v1418_v38 }
 0x19c   : > { %v1447_v57 = vadd.f32 %v1446_v36, %v1416_v24  ;;  %v1515_v60 = vadd.f32 %v1514_v29, %v1484_v25  ;;  %v1417_v33 = vadd.f32 %v1304_v11, %v1095_v10  ;;  %v1107_v61 = vpop.f32.mrf.mxu1  ;;  %v1488_v15 = vmul.f32 %v2623_v59, %v2623_v59 }
 0x19d   : > { %v1108_v35 = vadd.f32 %v1107_v61, %v932_v43  ;;  %v2000_v62 = vpop.f32.mrf.mxu0 }
 0x19e   : > { %v1516_v63 = vadd.f32 %v1515_v60, %v1485_v58  ;;  %v1448_v31 = vadd.f32 %v1447_v57, %v1417_v33  ;;  %v1486_v44 = vmul.f32 %v1417_v33, %v1417_v33  ;;  %v1965_v54 = vpop.f32.mrf.mxu1  ;;  %1558 = vxpose.xlu0.b32.cont [4/16] (narrow) %v1415_v14, 8  ;;  %v2633_v27 = vadd.f32 %v2000_v62, %v1116_v30 }
 0x19f   : > { %v1317_v0 = vpop.f32.mrf.mxu0  ;;  %v1119_v17 = vadd.f32 %v1965_v54, %v2603_v47 }
 0x1a0   : > { %v1449_v4 = vadd.f32 %v1448_v31, %v1418_v38  ;;  %v1517_v7 = vadd.f32 %v1516_v63, %v1486_v44  ;;  %v2626_v9 = vadd.f32 %v1317_v0, %v1108_v35  ;;  %v1110_v13 = vpop.f32.mrf.mxu1  ;;  %v1491_v11 = vmul.f32 %v2633_v27, %v2633_v27 }
 0x1a1   : > { %v1111_v6 = vadd.f32 %v1110_v13, %v2609_v21  ;;  %v2001_v43 = vpop.f32.mrf.mxu0 }
 0x1a2   : > { %v1518_v16 = vadd.f32 %v1517_v7, %v1487_v2  ;;  %v1450_v14 = vadd.f32 %v1449_v4, %v2623_v59  ;;  %v1968_v20 = vpop.f32.mrf.mxu1  ;;  %1559 = vxpose.xlu0.b32.cont [5/16] (narrow) %v1416_v24, 8  ;;  %v1489_v49 = vmul.f32 %v2626_v9, %v2626_v9  ;;  %v2641_v25 = vadd.f32 %v2001_v43, %v1119_v17 }
 0x1a3   : > { %v1320_v18 = vpop.f32.mrf.mxu0  ;;  %v1132_v36 = vadd.f32 %v1968_v20, %v2613_v51 }
 0x1a4   : > { %v1451_v26 = vadd.f32 %v1450_v14, %v2626_v9  ;;  %v1519_v21 = vadd.f32 %v1518_v16, %v1488_v15  ;;  %v2638_v23 = vadd.f32 %v1320_v18, %v1111_v6  ;;  %v1123_v3 = vpop.f32.mrf.mxu1  ;;  %v1492_v62 = vmul.f32 %v2641_v25, %v2641_v25 }
 0x1a5   : > { %v1124_v10 = vadd.f32 %v1123_v3, %v2615_v46  ;;  %v2004_v19 = vpop.f32.mrf.mxu0 }
 0x1a6   : > { %v1520_v47 = vadd.f32 %v1519_v21, %v1489_v49  ;;  %v1452_v24 = vadd.f32 %v1451_v26, %v2638_v23  ;;  %v1490_v29 = vmul.f32 %v2638_v23, %v2638_v23  ;;  %v1969_v1 = vpop.f32.mrf.mxu1  ;;  %1560 = vxpose.xlu0.b32.cont [6/16] (narrow) %v1417_v33, 8  ;;  %v2657_v44 = vadd.f32 %v2004_v19, %v1132_v36 }
 0x1a7   : > { %v1333_v55 = vpop.f32.mrf.mxu0  ;;  %v1135_v33 = vadd.f32 %v1969_v1, %v2619_v5 }
 0x1a8   : > { %v1453_v57 = vadd.f32 %v1452_v24, %v2633_v27  ;;  %v1521_v46 = vadd.f32 %v1520_v47, %v1490_v29  ;;  %v2650_v58 = vadd.f32 %v1333_v55, %v1124_v10  ;;  %v1126_v60 = vpop.f32.mrf.mxu1  ;;  %v1495_v14 = vmul.f32 %v2657_v44, %v2657_v44 }
 0x1a9   : > { %v1127_v61 = vadd.f32 %v1126_v60, %v2621_v56  ;;  %v2005_v35 = vpop.f32.mrf.mxu0 }
 0x1aa   : > { %v1522_v63 = vadd.f32 %v1521_v46, %v1491_v11  ;;  %v1454_v51 = vadd.f32 %v1453_v57, %v2641_v25  ;;  %v1972_v31 = vpop.f32.mrf.mxu1  ;;  %1561 = vxpose.xlu0.b32.cont [7/16] (narrow) %v1418_v38, 8  ;;  %v1493_v0 = vmul.f32 %v2650_v58, %v2650_v58  ;;  %v2665_v6 = vadd.f32 %v2005_v35, %v1135_v33 }
 0x1ab   : > { %v1336_v54 = vpop.f32.mrf.mxu0  ;;  %v1148_v16 = vadd.f32 %v1972_v31, %v2577_v53 }
 0x1ac   : > { %v1455_v30 = vadd.f32 %v1454_v51, %v2650_v58  ;;  %v1523_v56 = vadd.f32 %v1522_v63, %v1492_v62  ;;  %v2662_v2 = vadd.f32 %v1336_v54, %v1127_v61  ;;  %v1139_v4 = vpop.f32.mrf.mxu1  ;;  %v1496_v3 = vmul.f32 %v2665_v6, %v2665_v6 }
 0x1ad   : > { %v1140_v7 = vadd.f32 %v1139_v4, %v2579_v12  ;;  %v2008_v13 = vpop.f32.mrf.mxu0 }
 0x1ae   : > { %v1524_v5 = vadd.f32 %v1523_v56, %v1493_v0  ;;  %v1456_v38 = vadd.f32 %v1455_v30, %v2662_v2  ;;  %v1494_v43 = vmul.f32 %v2662_v2, %v2662_v2  ;;  %v1973_v15 = vpop.f32.mrf.mxu1  ;;  %1562 = vxpose.xlu0.b32.cont [8/16] (narrow) %v2623_v59, 8  ;;  %v1430_v47 = vadd.f32 %v2008_v13, %v1148_v16 }
 0x1af   : > { %v1349_v17 = vpop.f32.mrf.mxu0  ;;  %v1151_v59 = vadd.f32 %v1973_v15, %v2581_v22 }
 0x1b0   : > { %v1457_v12 = vadd.f32 %v1456_v38, %v2657_v44  ;;  %v1525_v20 = vadd.f32 %v1524_v5, %v1494_v43  ;;  %v1428_v18 = vadd.f32 %v1349_v17, %v1140_v7  ;;  %v1142_v26 = vpop.f32.mrf.mxu1  ;;  %v1499_v63 = vmul.f32 %v1430_v47, %v1430_v47 }
 0x1b1   : > { %v1143_v49 = vadd.f32 %v1142_v26, %v2583_v28  ;;  %v2009_v21 = vpop.f32.mrf.mxu0 }
 0x1b2   : > { %v1526_v10 = vadd.f32 %v1525_v20, %v1495_v14  ;;  %v1458_v53 = vadd.f32 %v1457_v12, %v2665_v6  ;;  %v1976_v19 = vpop.f32.mrf.mxu1  ;;  %1587 = vxpose.xlu1.b32.start [1/16] (narrow) %v1428_v18, 8  ;;  %1563 = vxpose.xlu0.b32.cont [9/16] (narrow) %v2626_v9, 8  ;;  %v1497_v1 = vmul.f32 %v1428_v18, %v1428_v18 }
 0x1b3   : > { %v1352_v24 = vpop.f32.mrf.mxu0  ;;  %v1431_v60 = vadd.f32 %v2009_v21, %v1151_v59  ;;  %v1164_v62 = vadd.f32 %v1976_v19, %v2585_v32 }
 0x1b4   : > { %v1459_v29 = vadd.f32 %v1458_v53, %v1428_v18  ;;  %v1527_v36 = vadd.f32 %v1526_v10, %v1496_v3  ;;  %v1429_v55 = vadd.f32 %v1352_v24, %v1143_v49  ;;  %v1155_v28 = vpop.f32.mrf.mxu1 }
 0x1b5   : > { %v1156_v11 = vadd.f32 %v1155_v28, %v2587_v8  ;;  %v2012_v57 = vpop.f32.mrf.mxu0  ;;  %v1500_v0 = vmul.f32 %v1431_v60, %v1431_v60 }
 0x1b6   : > { %v1528_v46 = vadd.f32 %v1527_v36, %v1497_v1  ;;  %v1460_v61 = vadd.f32 %v1459_v29, %v1429_v55  ;;  %v1498_v22 = vmul.f32 %v1429_v55, %v1429_v55  ;;  %v1977_v35 = vpop.f32.mrf.mxu1  ;;  %1588 = vxpose.xlu1.b32.cont [2/16] (narrow) %v1429_v55, 8  ;;  %1564 = vxpose.xlu0.b32.cont [10/16] (narrow) %v2638_v23, 8 }
 0x1b7   : > { %v1365_v9 = vpop.f32.mrf.mxu0  ;;  %v1167_v4 = vadd.f32 %v1977_v35, %v2589_v34  ;;  %v1434_v5 = vadd.f32 %v2012_v57, %v1164_v62 }
 0x1b8   : > { %v1461_v33 = vadd.f32 %v1460_v61, %v1430_v47  ;;  %v1529_v51 = vadd.f32 %v1528_v46, %v1498_v22  ;;  %v1432_v31 = vadd.f32 %v1365_v9, %v1156_v11  ;;  %v1158_v54 = vpop.f32.mrf.mxu1 }
 0x1b9   : > { %v1159_v30 = vadd.f32 %v1158_v54, %v2591_v37  ;;  %v2013_v8 = vpop.f32.mrf.mxu0  ;;  %v1503_v49 = vmul.f32 %v1434_v5, %v1434_v5 }
 0x1ba   : > { %v1530_v56 = vadd.f32 %v1529_v51, %v1499_v63  ;;  %v1462_v7 = vadd.f32 %v1461_v33, %v1431_v60  ;;  %v1980_v13 = vpop.f32.mrf.mxu1  ;;  %1589 = vxpose.xlu1.b32.cont [3/16] (narrow) %v1430_v47, 8  ;;  %1565 = vxpose.xlu0.b32.cont [11/16] (narrow) %v2633_v27, 8  ;;  %v1501_v38 = vmul.f32 %v1432_v31, %v1432_v31 }
 0x1bb   : > { %v1368_v32 = vpop.f32.mrf.mxu0  ;;  %v2688_v12 = vadd.f32 %v2013_v8, %v1167_v4  ;;  %v1180_v26 = vadd.f32 %v1980_v13, %v2593_v39 }
 0x1bc   : > { %v1463_v23 = vadd.f32 %v1462_v7, %v1432_v31  ;;  %v1531_v43 = vadd.f32 %v1530_v56, %v1500_v0  ;;  %v1433_v15 = vadd.f32 %v1368_v32, %v1159_v30  ;;  %v1171_v16 = vpop.f32.mrf.mxu1 }
 0x1bd   : > { %v1172_v17 = vadd.f32 %v1171_v16, %v2595_v40  ;;  %v2016_v37 = vpop.f32.mrf.mxu0  ;;  %v1504_v19 = vmul.f32 %v2688_v12, %v2688_v12 }
 0x1be   : > { %v1532_v14 = vadd.f32 %v1531_v43, %v1501_v38  ;;  %v1464_v20 = vadd.f32 %v1463_v23, %v1433_v15  ;;  %v1502_v34 = vmul.f32 %v1433_v15, %v1433_v15  ;;  %v1981_v18 = vpop.f32.mrf.mxu1  ;;  %1590 = vxpose.xlu1.b32.cont [4/16] (narrow) %v1431_v60, 8  ;;  %1566 = vxpose.xlu0.b32.cont [12/16] (narrow) %v2641_v25, 8 }
 0x1bf   : > { %v1381_v27 = vpop.f32.mrf.mxu0  ;;  %v1183_v24 = vadd.f32 %v1981_v18, %v2599_v42  ;;  %v1438_v25 = vadd.f32 %v2016_v37, %v1180_v26 }
 0x1c0   : > { %v1465_v21 = vadd.f32 %v1464_v20, %v1434_v5  ;;  %v1533_v3 = vadd.f32 %v1532_v14, %v1502_v34  ;;  %v1436_v10 = vadd.f32 %v1381_v27, %v1172_v17  ;;  %v1174_v59 = vpop.f32.mrf.mxu1 }
 0x1c1   : > { %v1175_v40 = vadd.f32 %v1174_v59, %v2601_v45  ;;  %v2017_v53 = vpop.f32.mrf.mxu0  ;;  %v1507_v9 = vmul.f32 %v1438_v25, %v1438_v25 }
 0x1c2   : > { %v1534_v47 = vadd.f32 %v1533_v3, %v1503_v49  ;;  %v1466_v29 = vadd.f32 %v1465_v21, %v2688_v12  ;;  %v1984_v39 = vpop.f32.mrf.mxu1  ;;  %1591 = vxpose.xlu1.b32.cont [5/16] (narrow) %v1432_v31, 8  ;;  %1567 = vxpose.xlu0.b32.cont [13/16] (narrow) %v2650_v58, 8  ;;  %v1505_v55 = vmul.f32 %v1436_v10, %v1436_v10 }
 0x1c3   : > { %v1384_v1 = vpop.f32.mrf.mxu0  ;;  %v1439_v61 = vadd.f32 %v2017_v53, %v1183_v24  ;;  %v1196_v62 = vadd.f32 %v1984_v39, %v2605_v41 }
 0x1c4   : > { %v1467_v36 = vadd.f32 %v1466_v29, %v1436_v10  ;;  %v1535_v28 = vadd.f32 %v1534_v47, %v1504_v19  ;;  %v1437_v11 = vadd.f32 %v1384_v1, %v1175_v40  ;;  %v1187_v45 = vpop.f32.mrf.mxu1 }
 0x1c5   : > { %v1188_v57 = vadd.f32 %v1187_v45, %v2607_v48  ;;  %v2020_v46 = vpop.f32.mrf.mxu0  ;;  %v1508_v30 = vmul.f32 %v1439_v61, %v1439_v61 }
 0x1c6   : > { %v1536_v60 = vadd.f32 %v1535_v28, %v1505_v55  ;;  %v1468_v22 = vadd.f32 %v1467_v36, %v1437_v11  ;;  %v1506_v42 = vmul.f32 %v1437_v11, %v1437_v11  ;;  %v1985_v35 = vpop.f32.mrf.mxu1  ;;  %1592 = vxpose.xlu1.b32.cont [6/16] (narrow) %v1433_v15, 8  ;;  %1568 = vxpose.xlu0.b32.cont [14/16] (narrow) %v2662_v2, 8 }
 0x1c7   : > { %v1397_v58 = vpop.f32.mrf.mxu0  ;;  %v1199_v0 = vadd.f32 %v1985_v35, %v2611_v50  ;;  %v1442_v4 = vadd.f32 %v2020_v46, %v1196_v62 }
 0x1c8   : > { %v1469_v63 = vadd.f32 %v1468_v22, %v1438_v25  ;;  %v1537_v33 = vadd.f32 %v1536_v60, %v1506_v42  ;;  %v1440_v51 = vadd.f32 %v1397_v58, %v1188_v57  ;;  %v1190_v31 = vpop.f32.mrf.mxu1 }
 0x1c9   : > { %v1191_v54 = vadd.f32 %v1190_v31, %v2617_v52  ;;  %v2021_v48 = vpop.f32.mrf.mxu0  ;;  %v1511_v52 = vmul.f32 %v1442_v4, %v1442_v4 }
 0x1ca   : > { %v1538_v8 = vadd.f32 %v1537_v33, %v1507_v9  ;;  %v1470_v56 = vadd.f32 %v1469_v63, %v1439_v61  ;;  %1593 = vxpose.xlu1.b32.cont [7/16] (narrow) %v1434_v5, 8  ;;  %1569 = vxpose.xlu0.b32.cont [15/16] (narrow) %v2657_v44, 8  ;;  %v1509_v7 = vmul.f32 %v1440_v51, %v1440_v51 }
 0x1cb   : > { %v1400_v41 = vpop.f32.mrf.mxu0  ;;  %v1443_v38 = vadd.f32 %v2021_v48, %v1199_v0 }
 0x1cc   : > { %v1471_v2 = vadd.f32 %v1470_v56, %v1440_v51  ;;  %v1539_v13 = vadd.f32 %v1538_v8, %v1508_v30  ;;  %v1441_v32 = vadd.f32 %v1400_v41, %v1191_v54 }
 0x1cd   : > { %v1512_v5 = vmul.f32 %v1443_v38, %v1443_v38 }
 0x1ce   : > { %v1540_v23 = vadd.f32 %v1539_v13, %v1509_v7  ;;  %v1472_v43 = vadd.f32 %v1471_v2, %v1441_v32  ;;  %v1510_v15 = vmul.f32 %v1441_v32, %v1441_v32  ;;  %1594 = vxpose.xlu1.b32.cont [8/16] (narrow) %v2688_v12, 8  ;;  %1570 = vxpose.xlu0.b32.end [16/16] (narrow) %v2665_v6, 8 }
 0x1d0   : > { %v1473_v50 = vadd.f32 %v1472_v43, %v1442_v4  ;;  %v1541_v16 = vadd.f32 %v1540_v23, %v1510_v15 }
 0x1d2   : > { %v1474_v17 = vadd.f32 %v1473_v50, %v1443_v38  ;;  %v1542_v44 = vadd.f32 %v1541_v16, %v1511_v52  ;;  %1595 = vxpose.xlu1.b32.cont [9/16] (narrow) %v1436_v10, 8 }
 0x1d4   : > { %v1475_v37 = vrot.slane %v1474_v17, 4  ;;  %v1543_v14 = vadd.f32 %v1542_v44, %v1512_v5 }
 0x1d6   : > { %v1476_v20 = vadd.f32 %v1475_v37, %v1474_v17  ;;  %v1544_v34 = vrot.slane %v1543_v14, 4  ;;  %1596 = vxpose.xlu1.b32.cont [10/16] (narrow) %v1437_v11, 8 }
 0x1d8   : > { %v1477_v18 = vrot.slane %v1476_v20, 2  ;;  %v1545_v26 = vadd.f32 %v1544_v34, %v1543_v14 }
 0x1da   : > { %v1478_v27 = vadd.f32 %v1477_v18, %v1476_v20  ;;  %v1546_v49 = vrot.slane %v1545_v26, 2  ;;  %1597 = vxpose.xlu1.b32.cont [11/16] (narrow) %v1438_v25, 8 }
 0x1dc   : > { %v1479_v12 = vrot.slane %v1478_v27, 1  ;;  %v1547_v6 = vadd.f32 %v1546_v49, %v1545_v26 }
 0x1de   : > { %v1548_v21 = vrot.slane %v1547_v6, 1  ;;  %1598 = vxpose.xlu1.b32.cont [12/16] (narrow) %v1439_v61, 8  ;;  %v1480_v3 = vadd.f32 %v1479_v12, %v1478_v27 }
 0x1e0   : > { %v1549_v59 = vadd.f32 %v1548_v21, %v1547_v6 }
 0x1e2   : > { %v1551_v10 = vsel %vm1550_vm6, %v1480_v3, %v1549_v59  ;;  %1599 = vxpose.xlu1.b32.cont [13/16] (narrow) %v1440_v51, 8 }
 0x1e3   : > { %v1553_v40 = vsel %vm1552_vm7, %v1551_v10, 0.0 }
 0x1e4   : > { %1554 = vst [vmem:[%s226_s10] sm:$0xff] %v1553_v40 }
 0x1e6   : > { %1600 = vxpose.xlu1.b32.cont [14/16] (narrow) %v1441_v32, 8 }
 0x1ea   : > { %1601 = vxpose.xlu1.b32.cont [15/16] (narrow) %v1442_v4, 8 }
 0x1ee   : > { %1602 = vxpose.xlu1.b32.end [16/16] (narrow) %v1443_v38, 8 }
 0x20e   : > { %v1571_v53 = vpop.trf.xlu0 }
 0x20f   : > { %1619 = vst [vmem:[%s218_s18] sm:$0xff] %v1571_v53 }
 0x22e   : > { %v1603_v19 = vpop.trf.xlu1 }
 0x22f   : > { %1620 = vst [vmem:[%s218_s18 + $0x8] sm:$0xff] %v1603_v19 }
 0x230 PF: > { %s14_s14 = sadd.s32 1, %s2121_s14   ;;  %s2727_s12 = smov %s2117_s13 }
 0x231   : > { %p11_p5 = scmp.ge.s32.totalorder %s14_s14, 4   ;;  %s2728_s13 = smov %s2730_s15 }
 0x233   :  { %13 = sbr.rel (!%p11_p5) target bundleno = 2 (0x2), region = 72 }

</bundles_post_ra>
